<compile_context>
chip_gen: v6e
topology: v6e:2x2x1
jax: 0.10.0
libtpu: 0.0.40
codegen_flags: <defaults>
</compile_context>

<pallas_src>
import math

import jax
import jax.numpy as jnp
import numpy as np
from jax.experimental import pallas as pl
from jax.experimental.pallas import tpu as pltpu


def _horn_kernel(inputs_ref,
                 omega_i_ref, gamma_i_ref, alpha_i_ref,
                 w1_ref, b1_ref,
                 omega_r_ref, gamma_r_ref, alpha_r_ref,
                 omega_o_ref, gamma_o_ref, alpha_o_ref,
                 w2_ref, b2_ref,
                 preds_ref, loss_ref,
                 outstack_ref):
    B, T, D = inputs_ref.shape
    R = w1_ref.shape[1]

    # ---- Loop-invariant parameter math, hoisted, at natural (1, S) shapes. ----
    osq_i = omega_i_ref[...] * omega_i_ref[...]          # |omega|^2 == omega*omega
    tg_i = 2.0 * jnp.abs(gamma_i_ref[...])
    al_i = alpha_i_ref[...]
    osq_r = omega_r_ref[...] * omega_r_ref[...]
    tg_r = 2.0 * jnp.abs(gamma_r_ref[...])
    al_r = alpha_r_ref[...]
    osq_o = omega_o_ref[...] * omega_o_ref[...]
    tg_o = 2.0 * jnp.abs(gamma_o_ref[...])
    al_o = alpha_o_ref[...]

    w1 = w1_ref[...]; b1 = b1_ref[...]
    w2 = w2_ref[...]; b2 = b2_ref[...]

    def x_half(x, y):
        # x_out = 0.9*clip(x + 0.5*y) + 0.1*x.  Independent of the force, hence
        # batch-replicated: computed once at (1, S).
        return 0.9 * jnp.clip(x + 0.5 * y, -5.0, 5.0) + 0.1 * x

    def y_half(x, y, osq, tg, al, force):
        # y_out; output shape follows `force` ((1, S) replicated or (B, 1, D) per-row).
        accel = al * force - tg * y - osq * x
        return 0.9 * jnp.clip(y + 0.5 * accel, -5.0, 5.0) + 0.1 * y

    xi = jnp.zeros((1, D), jnp.float32)
    yi = jnp.zeros((1, D), jnp.float32)
    xr = jnp.zeros((1, R), jnp.float32)
    yr = jnp.zeros((1, R), jnp.float32)
    xo = jnp.zeros((1, R), jnp.float32)
    yo = jnp.zeros((1, R), jnp.float32)

    acc_D = jnp.zeros((B, 1, D), jnp.float32)    # sum_b (inp_x - next_input)^2, t < T-1
    acc_R = jnp.zeros((1, R), jnp.float32)       # (res-proj)^2 + (out-res)^2 (replicated)

    force = inputs_ref[:, pl.ds(0, 1), :]        # (B, 1, D), each slice loaded exactly once

    for t in range(T):                           # fully unrolled; T small and static
        # ---- input oscillator ----
        inp_x = x_half(xi, yi)                                   # (1, D), batch-replicated
        y_row = y_half(xi, yi, osq_i, tg_i, al_i, force)         # (B, 1, D) per-row
        yi = jnp.mean(y_row, axis=0)                             # (1, D): leading-axis mean (VPU)
        xi = inp_x

        # ---- input projection (the only matmul left on the recurrent chain) ----
        proj = jnp.dot(inp_x, w1, preferred_element_type=jnp.float32) + b1    # (1, R)

        # ---- reservoir oscillator (fully batch-replicated) ----
        res_x = x_half(xr, yr)
        yr = y_half(xr, yr, osq_r, tg_r, al_r, proj)             # mean over batch == itself
        xr = res_x

        # ---- output oscillator (fully batch-replicated) ----
        out_x = x_half(xo, yo)
        yo = y_half(xo, yo, osq_o, tg_o, al_o, res_x)
        xo = out_x

        # Stash out_x; the readout matmul is deferred off the recurrent path.
        outstack_ref[pl.ds(t, 1), :] = out_x

        if t < T - 1:                                            # peeled at trace time
            nxt = inputs_ref[:, pl.ds(t + 1, 1), :]              # target AND next force
            acc_D = acc_D + (inp_x - nxt) ** 2
            acc_R = acc_R + (res_x - proj) ** 2 + (out_x - res_x) ** 2
            force = nxt

    # ---- deferred readout: one (T,R)@(R,D) MXU matmul, single contiguous writeback ----
    preds_td = jnp.dot(outstack_ref[...], w2, preferred_element_type=jnp.float32) + b2  # (T, D)
    preds_ref[...] = jnp.broadcast_to(preds_td, (B, T, D))       # consumer layout, no wrapper op

    # ---- deferred loss: two reductions total ----
    sum_d = jnp.sum(jnp.sum(acc_D, axis=0), keepdims=True)       # (1, 1)
    sum_r = jnp.sum(acc_R, keepdims=True)                        # (1, 1)
    loss_ref[...] = sum_d * (1.0 / (B * D)) + sum_r * (1.0 / R)


def bioacoustic_horn(inputs, params):
    """inputs: (B, T, D) float32.  Returns (predictions (B, T, D), total_pc_loss scalar)."""
    B, T, D = inputs.shape
    R = params["w1"].shape[1]

    args = (inputs.astype(jnp.float32),
            params["omega_i"], params["gamma_i"], params["alpha_i"],
            params["w1"], params["b1"],
            params["omega_r"], params["gamma_r"], params["alpha_r"],
            params["omega_o"], params["gamma_o"], params["alpha_o"],
            params["w2"], params["b2"])

    vmem = pl.BlockSpec(memory_space=pltpu.MemorySpace.VMEM)
    preds, loss = pl.pallas_call(
        _horn_kernel,
        out_shape=(jax.ShapeDtypeStruct((B, T, D), jnp.float32),
                   jax.ShapeDtypeStruct((1, 1), jnp.float32)),
        in_specs=[vmem] * len(args),
        out_specs=(vmem, vmem),
        scratch_shapes=[pltpu.VMEM((T, R), jnp.float32)],
    )(*args)
    return preds, loss[0, 0]


def reference(inputs, params):
    """Pure-JAX reference replicating the PyTorch forward exactly (un-optimized math)."""
    B, T, D = inputs.shape
    R = params["w1"].shape[1]

    def osc(x, y, omega, gamma, alpha, force):
        xb = jnp.broadcast_to(x, force.shape)
        yb = jnp.broadcast_to(y, force.shape)
        accel = alpha * force - 2.0 * jnp.abs(gamma) * yb - jnp.abs(omega) ** 2 * xb
        h = 0.5
        x_new = xb + h * yb
        y_new = yb + h * accel
        x_out = 0.9 * jnp.clip(x_new, -5.0, 5.0) + 0.1 * xb
        y_out = 0.9 * jnp.clip(y_new, -5.0, 5.0) + 0.1 * yb
        return x_out, jnp.mean(x_out, axis=0, keepdims=True), jnp.mean(y_out, axis=0, keepdims=True)

    xi = yi = jnp.zeros((1, D), jnp.float32)
    xr = yr = xo = yo = jnp.zeros((1, R), jnp.float32)
    loss = jnp.float32(0.0)
    preds = []
    for t in range(T):
        force = inputs[:, t]
        inp_x, xi, yi = osc(xi, yi, params["omega_i"], params["gamma_i"], params["alpha_i"], force)
        proj = inp_x @ params["w1"] + params["b1"]
        res_x, xr, yr = osc(xr, yr, params["omega_r"], params["gamma_r"], params["alpha_r"], proj)
        out_x, xo, yo = osc(xo, yo, params["omega_o"], params["gamma_o"], params["alpha_o"], res_x)
        pred = out_x @ params["w2"] + params["b2"]
        preds.append(pred)
        if t < T - 1:
            tgt = inputs[:, t + 1]
            loss = (loss
                    + jnp.mean((inp_x - tgt) ** 2)
                    + jnp.mean((res_x - proj) ** 2)
                    + jnp.mean((out_x - res_x) ** 2))
    return jnp.stack(preds, axis=1), loss


if __name__ == "__main__":
    # Small shapes consistent with the module: batch=2, seq_length=8,
    # input_dim=8, reservoir_size=32.
    B, T, D, R = 2, 8, 8, 32

    key = jax.random.PRNGKey(0)
    ks = jax.random.split(key, 16)
    u = lambda k, shape, lo, hi: jax.random.uniform(k, shape, jnp.float32, lo, hi)
    bd1 = 1.0 / math.sqrt(D)   # torch.nn.Linear default bound (fan_in = D)
    bd2 = 1.0 / math.sqrt(R)   # torch.nn.Linear default bound (fan_in = R)

    params = {
        # input_osc (trainable)
        "omega_i": u(ks[0], (1, D), 1.0, 3.0),
        "gamma_i": u(ks[1], (1, D), 0.1, 0.5),
        "alpha_i": u(ks[2], (1, D), 0.5, 1.5),
        # input_proj: stored transposed (in, out) so the kernel does x @ W
        "w1": u(ks[3], (D, R), -bd1, bd1),
        "b1": u(ks[4], (1, R), -bd1, bd1),
        # reservoir osc (non-trainable buffers)
        "omega_r": u(ks[5], (1, R), 1.0, 3.0),
        "gamma_r": u(ks[6], (1, R), 0.1, 0.5),
        "alpha_r": u(ks[7], (1, R), 0.5, 1.5),
        # output_osc (trainable)
        "omega_o": u(ks[8], (1, R), 1.0, 3.0),
        "gamma_o": u(ks[9], (1, R), 0.1, 0.5),
        "alpha_o": u(ks[10], (1, R), 0.5, 1.5),
        # readout: stored transposed (in, out)
        "w2": u(ks[11], (R, D), -bd2, bd2),
        "b2": u(ks[12], (1, D), -bd2, bd2),
    }
    inputs = jax.random.normal(ks[13], (B, T, D), jnp.float32)

    preds, loss = bioacoustic_horn(inputs, params)
    preds = jax.block_until_ready(preds)
    loss = jax.block_until_ready(loss)

    ref_preds, ref_loss = reference(inputs, params)
    np.testing.assert_allclose(np.asarray(preds), np.asarray(ref_preds),
                               rtol=1e-3, atol=1e-3)
    np.testing.assert_allclose(float(loss), float(ref_loss), rtol=1e-3, atol=1e-3)

    print("KERNEL_OK")
</pallas_src>

<mosaic_0001>
module attributes {stable_mosaic.version = 11 : i64} {
  func.func @_horn_kernel(%arg0: memref<2x8x8xf32, #tpu.memory_space<vmem>>, %arg1: memref<1x8xf32, #tpu.memory_space<vmem>>, %arg2: memref<1x8xf32, #tpu.memory_space<vmem>>, %arg3: memref<1x8xf32, #tpu.memory_space<vmem>>, %arg4: memref<8x32xf32, #tpu.memory_space<vmem>>, %arg5: memref<1x32xf32, #tpu.memory_space<vmem>>, %arg6: memref<1x32xf32, #tpu.memory_space<vmem>>, %arg7: memref<1x32xf32, #tpu.memory_space<vmem>>, %arg8: memref<1x32xf32, #tpu.memory_space<vmem>>, %arg9: memref<1x32xf32, #tpu.memory_space<vmem>>, %arg10: memref<1x32xf32, #tpu.memory_space<vmem>>, %arg11: memref<1x32xf32, #tpu.memory_space<vmem>>, %arg12: memref<32x8xf32, #tpu.memory_space<vmem>>, %arg13: memref<1x8xf32, #tpu.memory_space<vmem>>, %arg14: memref<2x8x8xf32, #tpu.memory_space<vmem>>, %arg15: memref<1x1xf32, #tpu.memory_space<vmem>>, %arg16: memref<8x32xf32, #tpu.memory_space<vmem>>) attributes {dimension_semantics = [], scalar_prefetch = 0 : i64, scratch_operands = 1 : i64, tpu.core_type = #tpu.core_type<tc>} {
    %c0 = arith.constant 0 : index
    %c0_0 = arith.constant 0 : index
    %0 = vector.load %arg1[%c0, %c0_0] : memref<1x8xf32, #tpu.memory_space<vmem>>, vector<1x8xf32>
    %c0_1 = arith.constant 0 : index
    %c0_2 = arith.constant 0 : index
    %1 = vector.load %arg1[%c0_1, %c0_2] : memref<1x8xf32, #tpu.memory_space<vmem>>, vector<1x8xf32>
    %2 = arith.mulf %0, %1 : vector<1x8xf32>
    %c0_3 = arith.constant 0 : index
    %c0_4 = arith.constant 0 : index
    %3 = vector.load %arg2[%c0_3, %c0_4] : memref<1x8xf32, #tpu.memory_space<vmem>>, vector<1x8xf32>
    %4 = math.absf %3 : vector<1x8xf32>
    %cst = arith.constant 2.000000e+00 : f32
    %5 = vector.broadcast %cst : f32 to vector<1x8xf32>
    %6 = arith.mulf %5, %4 : vector<1x8xf32>
    %c0_5 = arith.constant 0 : index
    %c0_6 = arith.constant 0 : index
    %7 = vector.load %arg3[%c0_5, %c0_6] : memref<1x8xf32, #tpu.memory_space<vmem>>, vector<1x8xf32>
    %c0_7 = arith.constant 0 : index
    %c0_8 = arith.constant 0 : index
    %8 = vector.load %arg6[%c0_7, %c0_8] : memref<1x32xf32, #tpu.memory_space<vmem>>, vector<1x32xf32>
    %c0_9 = arith.constant 0 : index
    %c0_10 = arith.constant 0 : index
    %9 = vector.load %arg6[%c0_9, %c0_10] : memref<1x32xf32, #tpu.memory_space<vmem>>, vector<1x32xf32>
    %10 = arith.mulf %8, %9 : vector<1x32xf32>
    %c0_11 = arith.constant 0 : index
    %c0_12 = arith.constant 0 : index
    %11 = vector.load %arg7[%c0_11, %c0_12] : memref<1x32xf32, #tpu.memory_space<vmem>>, vector<1x32xf32>
    %12 = math.absf %11 : vector<1x32xf32>
    %cst_13 = arith.constant 2.000000e+00 : f32
    %13 = vector.broadcast %cst_13 : f32 to vector<1x32xf32>
    %14 = arith.mulf %13, %12 : vector<1x32xf32>
    %c0_14 = arith.constant 0 : index
    %c0_15 = arith.constant 0 : index
    %15 = vector.load %arg8[%c0_14, %c0_15] : memref<1x32xf32, #tpu.memory_space<vmem>>, vector<1x32xf32>
    %c0_16 = arith.constant 0 : index
    %c0_17 = arith.constant 0 : index
    %16 = vector.load %arg9[%c0_16, %c0_17] : memref<1x32xf32, #tpu.memory_space<vmem>>, vector<1x32xf32>
    %c0_18 = arith.constant 0 : index
    %c0_19 = arith.constant 0 : index
    %17 = vector.load %arg9[%c0_18, %c0_19] : memref<1x32xf32, #tpu.memory_space<vmem>>, vector<1x32xf32>
    %18 = arith.mulf %16, %17 : vector<1x32xf32>
    %c0_20 = arith.constant 0 : index
    %c0_21 = arith.constant 0 : index
    %19 = vector.load %arg10[%c0_20, %c0_21] : memref<1x32xf32, #tpu.memory_space<vmem>>, vector<1x32xf32>
    %20 = math.absf %19 : vector<1x32xf32>
    %cst_22 = arith.constant 2.000000e+00 : f32
    %21 = vector.broadcast %cst_22 : f32 to vector<1x32xf32>
    %22 = arith.mulf %21, %20 : vector<1x32xf32>
    %c0_23 = arith.constant 0 : index
    %c0_24 = arith.constant 0 : index
    %23 = vector.load %arg11[%c0_23, %c0_24] : memref<1x32xf32, #tpu.memory_space<vmem>>, vector<1x32xf32>
    %c0_25 = arith.constant 0 : index
    %c0_26 = arith.constant 0 : index
    %24 = vector.load %arg4[%c0_25, %c0_26] : memref<8x32xf32, #tpu.memory_space<vmem>>, vector<8x32xf32>
    %c0_27 = arith.constant 0 : index
    %c0_28 = arith.constant 0 : index
    %25 = vector.load %arg5[%c0_27, %c0_28] : memref<1x32xf32, #tpu.memory_space<vmem>>, vector<1x32xf32>
    %c0_29 = arith.constant 0 : index
    %c0_30 = arith.constant 0 : index
    %26 = vector.load %arg12[%c0_29, %c0_30] : memref<32x8xf32, #tpu.memory_space<vmem>>, vector<32x8xf32>
    %c0_31 = arith.constant 0 : index
    %c0_32 = arith.constant 0 : index
    %27 = vector.load %arg13[%c0_31, %c0_32] : memref<1x8xf32, #tpu.memory_space<vmem>>, vector<1x8xf32>
    %cst_33 = arith.constant 0.000000e+00 : f32
    %28 = vector.broadcast %cst_33 : f32 to vector<1x8xf32>
    %cst_34 = arith.constant 0.000000e+00 : f32
    %29 = vector.broadcast %cst_34 : f32 to vector<1x8xf32>
    %cst_35 = arith.constant 0.000000e+00 : f32
    %30 = vector.broadcast %cst_35 : f32 to vector<1x32xf32>
    %cst_36 = arith.constant 0.000000e+00 : f32
    %31 = vector.broadcast %cst_36 : f32 to vector<1x32xf32>
    %cst_37 = arith.constant 0.000000e+00 : f32
    %32 = vector.broadcast %cst_37 : f32 to vector<1x32xf32>
    %cst_38 = arith.constant 0.000000e+00 : f32
    %33 = vector.broadcast %cst_38 : f32 to vector<1x32xf32>
    %cst_39 = arith.constant 0.000000e+00 : f32
    %34 = vector.broadcast %cst_39 : f32 to vector<2x1x8xf32>
    %cst_40 = arith.constant 0.000000e+00 : f32
    %35 = vector.broadcast %cst_40 : f32 to vector<1x32xf32>
    %c0_41 = arith.constant 0 : index
    %c0_42 = arith.constant 0 : index
    %c0_43 = arith.constant 0 : index
    %36 = vector.load %arg0[%c0_41, %c0_42, %c0_43] : memref<2x8x8xf32, #tpu.memory_space<vmem>>, vector<2x1x8xf32>
    %cst_44 = arith.constant 5.000000e-01 : f32
    %37 = vector.broadcast %cst_44 : f32 to vector<1x8xf32>
    %38 = arith.mulf %37, %29 : vector<1x8xf32>
    %39 = arith.addf %28, %38 : vector<1x8xf32>
    %cst_45 = arith.constant -5.000000e+00 : f32
    %cst_46 = arith.constant 5.000000e+00 : f32
    %40 = vector.broadcast %cst_45 : f32 to vector<1x8xf32>
    %41 = arith.maximumf %40, %39 : vector<1x8xf32>
    %42 = vector.broadcast %cst_46 : f32 to vector<1x8xf32>
    %43 = arith.minimumf %42, %41 : vector<1x8xf32>
    %cst_47 = arith.constant 0.899999976 : f32
    %44 = vector.broadcast %cst_47 : f32 to vector<1x8xf32>
    %45 = arith.mulf %44, %43 : vector<1x8xf32>
    %cst_48 = arith.constant 1.000000e-01 : f32
    %46 = vector.broadcast %cst_48 : f32 to vector<1x8xf32>
    %47 = arith.mulf %46, %28 : vector<1x8xf32>
    %48 = arith.addf %45, %47 : vector<1x8xf32>
    %49 = vector.shape_cast %7 : vector<1x8xf32> to vector<1x1x8xf32>
    %50 = vector.broadcast %49 : vector<1x1x8xf32> to vector<2x1x8xf32>
    %51 = arith.mulf %50, %36 : vector<2x1x8xf32>
    %52 = arith.mulf %6, %29 : vector<1x8xf32>
    %53 = vector.shape_cast %52 : vector<1x8xf32> to vector<1x1x8xf32>
    %54 = vector.broadcast %53 : vector<1x1x8xf32> to vector<2x1x8xf32>
    %55 = arith.subf %51, %54 : vector<2x1x8xf32>
    %56 = arith.mulf %2, %28 : vector<1x8xf32>
    %57 = vector.shape_cast %56 : vector<1x8xf32> to vector<1x1x8xf32>
    %58 = vector.broadcast %57 : vector<1x1x8xf32> to vector<2x1x8xf32>
    %59 = arith.subf %55, %58 : vector<2x1x8xf32>
    %cst_49 = arith.constant 5.000000e-01 : f32
    %60 = vector.broadcast %cst_49 : f32 to vector<2x1x8xf32>
    %61 = arith.mulf %60, %59 : vector<2x1x8xf32>
    %62 = vector.shape_cast %29 : vector<1x8xf32> to vector<1x1x8xf32>
    %63 = vector.broadcast %62 : vector<1x1x8xf32> to vector<2x1x8xf32>
    %64 = arith.addf %63, %61 : vector<2x1x8xf32>
    %cst_50 = arith.constant -5.000000e+00 : f32
    %cst_51 = arith.constant 5.000000e+00 : f32
    %65 = vector.broadcast %cst_50 : f32 to vector<2x1x8xf32>
    %66 = arith.maximumf %65, %64 : vector<2x1x8xf32>
    %67 = vector.broadcast %cst_51 : f32 to vector<2x1x8xf32>
    %68 = arith.minimumf %67, %66 : vector<2x1x8xf32>
    %cst_52 = arith.constant 0.899999976 : f32
    %69 = vector.broadcast %cst_52 : f32 to vector<2x1x8xf32>
    %70 = arith.mulf %69, %68 : vector<2x1x8xf32>
    %cst_53 = arith.constant 1.000000e-01 : f32
    %71 = vector.broadcast %cst_53 : f32 to vector<1x8xf32>
    %72 = arith.mulf %71, %29 : vector<1x8xf32>
    %73 = vector.shape_cast %72 : vector<1x8xf32> to vector<1x1x8xf32>
    %74 = vector.broadcast %73 : vector<1x1x8xf32> to vector<2x1x8xf32>
    %75 = arith.addf %70, %74 : vector<2x1x8xf32>
    %cst_54 = arith.constant dense<0.000000e+00> : vector<1x8xf32>
    %76 = vector.multi_reduction <add>, %75, %cst_54 [0] : vector<2x1x8xf32> to vector<1x8xf32>
    %cst_55 = arith.constant 2.000000e+00 : f32
    %77 = vector.broadcast %cst_55 : f32 to vector<1x8xf32>
    %78 = arith.divf %76, %77 : vector<1x8xf32>
    %cst_56 = arith.constant dense<0.000000e+00> : vector<1x32xf32>
    %79 = tpu.matmul %48, %24, %cst_56 {dimension_numbers = #tpu.dot_dimension_numbers<[1], [0], [0], [1], [0, 0, 1, 1], [], []>} : vector<1x8xf32>, vector<8x32xf32>, vector<1x32xf32> -> vector<1x32xf32>
    %80 = arith.addf %79, %25 : vector<1x32xf32>
    %cst_57 = arith.constant 5.000000e-01 : f32
    %81 = vector.broadcast %cst_57 : f32 to vector<1x32xf32>
    %82 = arith.mulf %81, %31 : vector<1x32xf32>
    %83 = arith.addf %30, %82 : vector<1x32xf32>
    %cst_58 = arith.constant -5.000000e+00 : f32
    %cst_59 = arith.constant 5.000000e+00 : f32
    %84 = vector.broadcast %cst_58 : f32 to vector<1x32xf32>
    %85 = arith.maximumf %84, %83 : vector<1x32xf32>
    %86 = vector.broadcast %cst_59 : f32 to vector<1x32xf32>
    %87 = arith.minimumf %86, %85 : vector<1x32xf32>
    %cst_60 = arith.constant 0.899999976 : f32
    %88 = vector.broadcast %cst_60 : f32 to vector<1x32xf32>
    %89 = arith.mulf %88, %87 : vector<1x32xf32>
    %cst_61 = arith.constant 1.000000e-01 : f32
    %90 = vector.broadcast %cst_61 : f32 to vector<1x32xf32>
    %91 = arith.mulf %90, %30 : vector<1x32xf32>
    %92 = arith.addf %89, %91 : vector<1x32xf32>
    %93 = arith.mulf %15, %80 : vector<1x32xf32>
    %94 = arith.mulf %14, %31 : vector<1x32xf32>
    %95 = arith.subf %93, %94 : vector<1x32xf32>
    %96 = arith.mulf %10, %30 : vector<1x32xf32>
    %97 = arith.subf %95, %96 : vector<1x32xf32>
    %cst_62 = arith.constant 5.000000e-01 : f32
    %98 = vector.broadcast %cst_62 : f32 to vector<1x32xf32>
    %99 = arith.mulf %98, %97 : vector<1x32xf32>
    %100 = arith.addf %31, %99 : vector<1x32xf32>
    %cst_63 = arith.constant -5.000000e+00 : f32
    %cst_64 = arith.constant 5.000000e+00 : f32
    %101 = vector.broadcast %cst_63 : f32 to vector<1x32xf32>
    %102 = arith.maximumf %101, %100 : vector<1x32xf32>
    %103 = vector.broadcast %cst_64 : f32 to vector<1x32xf32>
    %104 = arith.minimumf %103, %102 : vector<1x32xf32>
    %cst_65 = arith.constant 0.899999976 : f32
    %105 = vector.broadcast %cst_65 : f32 to vector<1x32xf32>
    %106 = arith.mulf %105, %104 : vector<1x32xf32>
    %cst_66 = arith.constant 1.000000e-01 : f32
    %107 = vector.broadcast %cst_66 : f32 to vector<1x32xf32>
    %108 = arith.mulf %107, %31 : vector<1x32xf32>
    %109 = arith.addf %106, %108 : vector<1x32xf32>
    %cst_67 = arith.constant 5.000000e-01 : f32
    %110 = vector.broadcast %cst_67 : f32 to vector<1x32xf32>
    %111 = arith.mulf %110, %33 : vector<1x32xf32>
    %112 = arith.addf %32, %111 : vector<1x32xf32>
    %cst_68 = arith.constant -5.000000e+00 : f32
    %cst_69 = arith.constant 5.000000e+00 : f32
    %113 = vector.broadcast %cst_68 : f32 to vector<1x32xf32>
    %114 = arith.maximumf %113, %112 : vector<1x32xf32>
    %115 = vector.broadcast %cst_69 : f32 to vector<1x32xf32>
    %116 = arith.minimumf %115, %114 : vector<1x32xf32>
    %cst_70 = arith.constant 0.899999976 : f32
    %117 = vector.broadcast %cst_70 : f32 to vector<1x32xf32>
    %118 = arith.mulf %117, %116 : vector<1x32xf32>
    %cst_71 = arith.constant 1.000000e-01 : f32
    %119 = vector.broadcast %cst_71 : f32 to vector<1x32xf32>
    %120 = arith.mulf %119, %32 : vector<1x32xf32>
    %121 = arith.addf %118, %120 : vector<1x32xf32>
    %122 = arith.mulf %23, %92 : vector<1x32xf32>
    %123 = arith.mulf %22, %33 : vector<1x32xf32>
    %124 = arith.subf %122, %123 : vector<1x32xf32>
    %125 = arith.mulf %18, %32 : vector<1x32xf32>
    %126 = arith.subf %124, %125 : vector<1x32xf32>
    %cst_72 = arith.constant 5.000000e-01 : f32
    %127 = vector.broadcast %cst_72 : f32 to vector<1x32xf32>
    %128 = arith.mulf %127, %126 : vector<1x32xf32>
    %129 = arith.addf %33, %128 : vector<1x32xf32>
    %cst_73 = arith.constant -5.000000e+00 : f32
    %cst_74 = arith.constant 5.000000e+00 : f32
    %130 = vector.broadcast %cst_73 : f32 to vector<1x32xf32>
    %131 = arith.maximumf %130, %129 : vector<1x32xf32>
    %132 = vector.broadcast %cst_74 : f32 to vector<1x32xf32>
    %133 = arith.minimumf %132, %131 : vector<1x32xf32>
    %cst_75 = arith.constant 0.899999976 : f32
    %134 = vector.broadcast %cst_75 : f32 to vector<1x32xf32>
    %135 = arith.mulf %134, %133 : vector<1x32xf32>
    %cst_76 = arith.constant 1.000000e-01 : f32
    %136 = vector.broadcast %cst_76 : f32 to vector<1x32xf32>
    %137 = arith.mulf %136, %33 : vector<1x32xf32>
    %138 = arith.addf %135, %137 : vector<1x32xf32>
    %c0_77 = arith.constant 0 : index
    %c0_78 = arith.constant 0 : index
    %139 = vector.load %arg16[%c0_77, %c0_78] : memref<8x32xf32, #tpu.memory_space<vmem>>, vector<1x32xf32>
    tpu.vector_store %arg16[%c0_77, %c0_78], %121 {strides = array<i32>} : memref<8x32xf32, #tpu.memory_space<vmem>>, vector<1x32xf32>,
    %c0_79 = arith.constant 0 : index
    %c1 = arith.constant 1 : index
    %c0_80 = arith.constant 0 : index
    %140 = vector.load %arg0[%c0_79, %c1, %c0_80] : memref<2x8x8xf32, #tpu.memory_space<vmem>>, vector<2x1x8xf32>
    %141 = vector.shape_cast %48 : vector<1x8xf32> to vector<1x1x8xf32>
    %142 = vector.broadcast %141 : vector<1x1x8xf32> to vector<2x1x8xf32>
    %143 = arith.subf %142, %140 : vector<2x1x8xf32>
    %144 = arith.mulf %143, %143 : vector<2x1x8xf32>
    %145 = arith.addf %34, %144 : vector<2x1x8xf32>
    %146 = arith.subf %92, %80 : vector<1x32xf32>
    %147 = arith.mulf %146, %146 : vector<1x32xf32>
    %148 = arith.addf %35, %147 : vector<1x32xf32>
    %149 = arith.subf %121, %92 : vector<1x32xf32>
    %150 = arith.mulf %149, %149 : vector<1x32xf32>
    %151 = arith.addf %148, %150 : vector<1x32xf32>
    %cst_81 = arith.constant 5.000000e-01 : f32
    %152 = vector.broadcast %cst_81 : f32 to vector<1x8xf32>
    %153 = arith.mulf %152, %78 : vector<1x8xf32>
    %154 = arith.addf %48, %153 : vector<1x8xf32>
    %cst_82 = arith.constant -5.000000e+00 : f32
    %cst_83 = arith.constant 5.000000e+00 : f32
    %155 = vector.broadcast %cst_82 : f32 to vector<1x8xf32>
    %156 = arith.maximumf %155, %154 : vector<1x8xf32>
    %157 = vector.broadcast %cst_83 : f32 to vector<1x8xf32>
    %158 = arith.minimumf %157, %156 : vector<1x8xf32>
    %cst_84 = arith.constant 0.899999976 : f32
    %159 = vector.broadcast %cst_84 : f32 to vector<1x8xf32>
    %160 = arith.mulf %159, %158 : vector<1x8xf32>
    %cst_85 = arith.constant 1.000000e-01 : f32
    %161 = vector.broadcast %cst_85 : f32 to vector<1x8xf32>
    %162 = arith.mulf %161, %48 : vector<1x8xf32>
    %163 = arith.addf %160, %162 : vector<1x8xf32>
    %164 = vector.shape_cast %7 : vector<1x8xf32> to vector<1x1x8xf32>
    %165 = vector.broadcast %164 : vector<1x1x8xf32> to vector<2x1x8xf32>
    %166 = arith.mulf %165, %140 : vector<2x1x8xf32>
    %167 = arith.mulf %6, %78 : vector<1x8xf32>
    %168 = vector.shape_cast %167 : vector<1x8xf32> to vector<1x1x8xf32>
    %169 = vector.broadcast %168 : vector<1x1x8xf32> to vector<2x1x8xf32>
    %170 = arith.subf %166, %169 : vector<2x1x8xf32>
    %171 = arith.mulf %2, %48 : vector<1x8xf32>
    %172 = vector.shape_cast %171 : vector<1x8xf32> to vector<1x1x8xf32>
    %173 = vector.broadcast %172 : vector<1x1x8xf32> to vector<2x1x8xf32>
    %174 = arith.subf %170, %173 : vector<2x1x8xf32>
    %cst_86 = arith.constant 5.000000e-01 : f32
    %175 = vector.broadcast %cst_86 : f32 to vector<2x1x8xf32>
    %176 = arith.mulf %175, %174 : vector<2x1x8xf32>
    %177 = vector.shape_cast %78 : vector<1x8xf32> to vector<1x1x8xf32>
    %178 = vector.broadcast %177 : vector<1x1x8xf32> to vector<2x1x8xf32>
    %179 = arith.addf %178, %176 : vector<2x1x8xf32>
    %cst_87 = arith.constant -5.000000e+00 : f32
    %cst_88 = arith.constant 5.000000e+00 : f32
    %180 = vector.broadcast %cst_87 : f32 to vector<2x1x8xf32>
    %181 = arith.maximumf %180, %179 : vector<2x1x8xf32>
    %182 = vector.broadcast %cst_88 : f32 to vector<2x1x8xf32>
    %183 = arith.minimumf %182, %181 : vector<2x1x8xf32>
    %cst_89 = arith.constant 0.899999976 : f32
    %184 = vector.broadcast %cst_89 : f32 to vector<2x1x8xf32>
    %185 = arith.mulf %184, %183 : vector<2x1x8xf32>
    %cst_90 = arith.constant 1.000000e-01 : f32
    %186 = vector.broadcast %cst_90 : f32 to vector<1x8xf32>
    %187 = arith.mulf %186, %78 : vector<1x8xf32>
    %188 = vector.shape_cast %187 : vector<1x8xf32> to vector<1x1x8xf32>
    %189 = vector.broadcast %188 : vector<1x1x8xf32> to vector<2x1x8xf32>
    %190 = arith.addf %185, %189 : vector<2x1x8xf32>
    %cst_91 = arith.constant dense<0.000000e+00> : vector<1x8xf32>
    %191 = vector.multi_reduction <add>, %190, %cst_91 [0] : vector<2x1x8xf32> to vector<1x8xf32>
    %cst_92 = arith.constant 2.000000e+00 : f32
    %192 = vector.broadcast %cst_92 : f32 to vector<1x8xf32>
    %193 = arith.divf %191, %192 : vector<1x8xf32>
    %cst_93 = arith.constant dense<0.000000e+00> : vector<1x32xf32>
    %194 = tpu.matmul %163, %24, %cst_93 {dimension_numbers = #tpu.dot_dimension_numbers<[1], [0], [0], [1], [0, 0, 1, 1], [], []>} : vector<1x8xf32>, vector<8x32xf32>, vector<1x32xf32> -> vector<1x32xf32>
    %195 = arith.addf %194, %25 : vector<1x32xf32>
    %cst_94 = arith.constant 5.000000e-01 : f32
    %196 = vector.broadcast %cst_94 : f32 to vector<1x32xf32>
    %197 = arith.mulf %196, %109 : vector<1x32xf32>
    %198 = arith.addf %92, %197 : vector<1x32xf32>
    %cst_95 = arith.constant -5.000000e+00 : f32
    %cst_96 = arith.constant 5.000000e+00 : f32
    %199 = vector.broadcast %cst_95 : f32 to vector<1x32xf32>
    %200 = arith.maximumf %199, %198 : vector<1x32xf32>
    %201 = vector.broadcast %cst_96 : f32 to vector<1x32xf32>
    %202 = arith.minimumf %201, %200 : vector<1x32xf32>
    %cst_97 = arith.constant 0.899999976 : f32
    %203 = vector.broadcast %cst_97 : f32 to vector<1x32xf32>
    %204 = arith.mulf %203, %202 : vector<1x32xf32>
    %cst_98 = arith.constant 1.000000e-01 : f32
    %205 = vector.broadcast %cst_98 : f32 to vector<1x32xf32>
    %206 = arith.mulf %205, %92 : vector<1x32xf32>
    %207 = arith.addf %204, %206 : vector<1x32xf32>
    %208 = arith.mulf %15, %195 : vector<1x32xf32>
    %209 = arith.mulf %14, %109 : vector<1x32xf32>
    %210 = arith.subf %208, %209 : vector<1x32xf32>
    %211 = arith.mulf %10, %92 : vector<1x32xf32>
    %212 = arith.subf %210, %211 : vector<1x32xf32>
    %cst_99 = arith.constant 5.000000e-01 : f32
    %213 = vector.broadcast %cst_99 : f32 to vector<1x32xf32>
    %214 = arith.mulf %213, %212 : vector<1x32xf32>
    %215 = arith.addf %109, %214 : vector<1x32xf32>
    %cst_100 = arith.constant -5.000000e+00 : f32
    %cst_101 = arith.constant 5.000000e+00 : f32
    %216 = vector.broadcast %cst_100 : f32 to vector<1x32xf32>
    %217 = arith.maximumf %216, %215 : vector<1x32xf32>
    %218 = vector.broadcast %cst_101 : f32 to vector<1x32xf32>
    %219 = arith.minimumf %218, %217 : vector<1x32xf32>
    %cst_102 = arith.constant 0.899999976 : f32
    %220 = vector.broadcast %cst_102 : f32 to vector<1x32xf32>
    %221 = arith.mulf %220, %219 : vector<1x32xf32>
    %cst_103 = arith.constant 1.000000e-01 : f32
    %222 = vector.broadcast %cst_103 : f32 to vector<1x32xf32>
    %223 = arith.mulf %222, %109 : vector<1x32xf32>
    %224 = arith.addf %221, %223 : vector<1x32xf32>
    %cst_104 = arith.constant 5.000000e-01 : f32
    %225 = vector.broadcast %cst_104 : f32 to vector<1x32xf32>
    %226 = arith.mulf %225, %138 : vector<1x32xf32>
    %227 = arith.addf %121, %226 : vector<1x32xf32>
    %cst_105 = arith.constant -5.000000e+00 : f32
    %cst_106 = arith.constant 5.000000e+00 : f32
    %228 = vector.broadcast %cst_105 : f32 to vector<1x32xf32>
    %229 = arith.maximumf %228, %227 : vector<1x32xf32>
    %230 = vector.broadcast %cst_106 : f32 to vector<1x32xf32>
    %231 = arith.minimumf %230, %229 : vector<1x32xf32>
    %cst_107 = arith.constant 0.899999976 : f32
    %232 = vector.broadcast %cst_107 : f32 to vector<1x32xf32>
    %233 = arith.mulf %232, %231 : vector<1x32xf32>
    %cst_108 = arith.constant 1.000000e-01 : f32
    %234 = vector.broadcast %cst_108 : f32 to vector<1x32xf32>
    %235 = arith.mulf %234, %121 : vector<1x32xf32>
    %236 = arith.addf %233, %235 : vector<1x32xf32>
    %237 = arith.mulf %23, %207 : vector<1x32xf32>
    %238 = arith.mulf %22, %138 : vector<1x32xf32>
    %239 = arith.subf %237, %238 : vector<1x32xf32>
    %240 = arith.mulf %18, %121 : vector<1x32xf32>
    %241 = arith.subf %239, %240 : vector<1x32xf32>
    %cst_109 = arith.constant 5.000000e-01 : f32
    %242 = vector.broadcast %cst_109 : f32 to vector<1x32xf32>
    %243 = arith.mulf %242, %241 : vector<1x32xf32>
    %244 = arith.addf %138, %243 : vector<1x32xf32>
    %cst_110 = arith.constant -5.000000e+00 : f32
    %cst_111 = arith.constant 5.000000e+00 : f32
    %245 = vector.broadcast %cst_110 : f32 to vector<1x32xf32>
    %246 = arith.maximumf %245, %244 : vector<1x32xf32>
    %247 = vector.broadcast %cst_111 : f32 to vector<1x32xf32>
    %248 = arith.minimumf %247, %246 : vector<1x32xf32>
    %cst_112 = arith.constant 0.899999976 : f32
    %249 = vector.broadcast %cst_112 : f32 to vector<1x32xf32>
    %250 = arith.mulf %249, %248 : vector<1x32xf32>
    %cst_113 = arith.constant 1.000000e-01 : f32
    %251 = vector.broadcast %cst_113 : f32 to vector<1x32xf32>
    %252 = arith.mulf %251, %138 : vector<1x32xf32>
    %253 = arith.addf %250, %252 : vector<1x32xf32>
    %c1_114 = arith.constant 1 : index
    %c0_115 = arith.constant 0 : index
    %254 = vector.load %arg16[%c1_114, %c0_115] : memref<8x32xf32, #tpu.memory_space<vmem>>, vector<1x32xf32>
    tpu.vector_store %arg16[%c1_114, %c0_115], %236 {strides = array<i32>} : memref<8x32xf32, #tpu.memory_space<vmem>>, vector<1x32xf32>,
    %c0_116 = arith.constant 0 : index
    %c2 = arith.constant 2 : index
    %c0_117 = arith.constant 0 : index
    %255 = vector.load %arg0[%c0_116, %c2, %c0_117] : memref<2x8x8xf32, #tpu.memory_space<vmem>>, vector<2x1x8xf32>
    %256 = vector.shape_cast %163 : vector<1x8xf32> to vector<1x1x8xf32>
    %257 = vector.broadcast %256 : vector<1x1x8xf32> to vector<2x1x8xf32>
    %258 = arith.subf %257, %255 : vector<2x1x8xf32>
    %259 = arith.mulf %258, %258 : vector<2x1x8xf32>
    %260 = arith.addf %145, %259 : vector<2x1x8xf32>
    %261 = arith.subf %207, %195 : vector<1x32xf32>
    %262 = arith.mulf %261, %261 : vector<1x32xf32>
    %263 = arith.addf %151, %262 : vector<1x32xf32>
    %264 = arith.subf %236, %207 : vector<1x32xf32>
    %265 = arith.mulf %264, %264 : vector<1x32xf32>
    %266 = arith.addf %263, %265 : vector<1x32xf32>
    %cst_118 = arith.constant 5.000000e-01 : f32
    %267 = vector.broadcast %cst_118 : f32 to vector<1x8xf32>
    %268 = arith.mulf %267, %193 : vector<1x8xf32>
    %269 = arith.addf %163, %268 : vector<1x8xf32>
    %cst_119 = arith.constant -5.000000e+00 : f32
    %cst_120 = arith.constant 5.000000e+00 : f32
    %270 = vector.broadcast %cst_119 : f32 to vector<1x8xf32>
    %271 = arith.maximumf %270, %269 : vector<1x8xf32>
    %272 = vector.broadcast %cst_120 : f32 to vector<1x8xf32>
    %273 = arith.minimumf %272, %271 : vector<1x8xf32>
    %cst_121 = arith.constant 0.899999976 : f32
    %274 = vector.broadcast %cst_121 : f32 to vector<1x8xf32>
    %275 = arith.mulf %274, %273 : vector<1x8xf32>
    %cst_122 = arith.constant 1.000000e-01 : f32
    %276 = vector.broadcast %cst_122 : f32 to vector<1x8xf32>
    %277 = arith.mulf %276, %163 : vector<1x8xf32>
    %278 = arith.addf %275, %277 : vector<1x8xf32>
    %279 = vector.shape_cast %7 : vector<1x8xf32> to vector<1x1x8xf32>
    %280 = vector.broadcast %279 : vector<1x1x8xf32> to vector<2x1x8xf32>
    %281 = arith.mulf %280, %255 : vector<2x1x8xf32>
    %282 = arith.mulf %6, %193 : vector<1x8xf32>
    %283 = vector.shape_cast %282 : vector<1x8xf32> to vector<1x1x8xf32>
    %284 = vector.broadcast %283 : vector<1x1x8xf32> to vector<2x1x8xf32>
    %285 = arith.subf %281, %284 : vector<2x1x8xf32>
    %286 = arith.mulf %2, %163 : vector<1x8xf32>
    %287 = vector.shape_cast %286 : vector<1x8xf32> to vector<1x1x8xf32>
    %288 = vector.broadcast %287 : vector<1x1x8xf32> to vector<2x1x8xf32>
    %289 = arith.subf %285, %288 : vector<2x1x8xf32>
    %cst_123 = arith.constant 5.000000e-01 : f32
    %290 = vector.broadcast %cst_123 : f32 to vector<2x1x8xf32>
    %291 = arith.mulf %290, %289 : vector<2x1x8xf32>
    %292 = vector.shape_cast %193 : vector<1x8xf32> to vector<1x1x8xf32>
    %293 = vector.broadcast %292 : vector<1x1x8xf32> to vector<2x1x8xf32>
    %294 = arith.addf %293, %291 : vector<2x1x8xf32>
    %cst_124 = arith.constant -5.000000e+00 : f32
    %cst_125 = arith.constant 5.000000e+00 : f32
    %295 = vector.broadcast %cst_124 : f32 to vector<2x1x8xf32>
    %296 = arith.maximumf %295, %294 : vector<2x1x8xf32>
    %297 = vector.broadcast %cst_125 : f32 to vector<2x1x8xf32>
    %298 = arith.minimumf %297, %296 : vector<2x1x8xf32>
    %cst_126 = arith.constant 0.899999976 : f32
    %299 = vector.broadcast %cst_126 : f32 to vector<2x1x8xf32>
    %300 = arith.mulf %299, %298 : vector<2x1x8xf32>
    %cst_127 = arith.constant 1.000000e-01 : f32
    %301 = vector.broadcast %cst_127 : f32 to vector<1x8xf32>
    %302 = arith.mulf %301, %193 : vector<1x8xf32>
    %303 = vector.shape_cast %302 : vector<1x8xf32> to vector<1x1x8xf32>
    %304 = vector.broadcast %303 : vector<1x1x8xf32> to vector<2x1x8xf32>
    %305 = arith.addf %300, %304 : vector<2x1x8xf32>
    %cst_128 = arith.constant dense<0.000000e+00> : vector<1x8xf32>
    %306 = vector.multi_reduction <add>, %305, %cst_128 [0] : vector<2x1x8xf32> to vector<1x8xf32>
    %cst_129 = arith.constant 2.000000e+00 : f32
    %307 = vector.broadcast %cst_129 : f32 to vector<1x8xf32>
    %308 = arith.divf %306, %307 : vector<1x8xf32>
    %cst_130 = arith.constant dense<0.000000e+00> : vector<1x32xf32>
    %309 = tpu.matmul %278, %24, %cst_130 {dimension_numbers = #tpu.dot_dimension_numbers<[1], [0], [0], [1], [0, 0, 1, 1], [], []>} : vector<1x8xf32>, vector<8x32xf32>, vector<1x32xf32> -> vector<1x32xf32>
    %310 = arith.addf %309, %25 : vector<1x32xf32>
    %cst_131 = arith.constant 5.000000e-01 : f32
    %311 = vector.broadcast %cst_131 : f32 to vector<1x32xf32>
    %312 = arith.mulf %311, %224 : vector<1x32xf32>
    %313 = arith.addf %207, %312 : vector<1x32xf32>
    %cst_132 = arith.constant -5.000000e+00 : f32
    %cst_133 = arith.constant 5.000000e+00 : f32
    %314 = vector.broadcast %cst_132 : f32 to vector<1x32xf32>
    %315 = arith.maximumf %314, %313 : vector<1x32xf32>
    %316 = vector.broadcast %cst_133 : f32 to vector<1x32xf32>
    %317 = arith.minimumf %316, %315 : vector<1x32xf32>
    %cst_134 = arith.constant 0.899999976 : f32
    %318 = vector.broadcast %cst_134 : f32 to vector<1x32xf32>
    %319 = arith.mulf %318, %317 : vector<1x32xf32>
    %cst_135 = arith.constant 1.000000e-01 : f32
    %320 = vector.broadcast %cst_135 : f32 to vector<1x32xf32>
    %321 = arith.mulf %320, %207 : vector<1x32xf32>
    %322 = arith.addf %319, %321 : vector<1x32xf32>
    %323 = arith.mulf %15, %310 : vector<1x32xf32>
    %324 = arith.mulf %14, %224 : vector<1x32xf32>
    %325 = arith.subf %323, %324 : vector<1x32xf32>
    %326 = arith.mulf %10, %207 : vector<1x32xf32>
    %327 = arith.subf %325, %326 : vector<1x32xf32>
    %cst_136 = arith.constant 5.000000e-01 : f32
    %328 = vector.broadcast %cst_136 : f32 to vector<1x32xf32>
    %329 = arith.mulf %328, %327 : vector<1x32xf32>
    %330 = arith.addf %224, %329 : vector<1x32xf32>
    %cst_137 = arith.constant -5.000000e+00 : f32
    %cst_138 = arith.constant 5.000000e+00 : f32
    %331 = vector.broadcast %cst_137 : f32 to vector<1x32xf32>
    %332 = arith.maximumf %331, %330 : vector<1x32xf32>
    %333 = vector.broadcast %cst_138 : f32 to vector<1x32xf32>
    %334 = arith.minimumf %333, %332 : vector<1x32xf32>
    %cst_139 = arith.constant 0.899999976 : f32
    %335 = vector.broadcast %cst_139 : f32 to vector<1x32xf32>
    %336 = arith.mulf %335, %334 : vector<1x32xf32>
    %cst_140 = arith.constant 1.000000e-01 : f32
    %337 = vector.broadcast %cst_140 : f32 to vector<1x32xf32>
    %338 = arith.mulf %337, %224 : vector<1x32xf32>
    %339 = arith.addf %336, %338 : vector<1x32xf32>
    %cst_141 = arith.constant 5.000000e-01 : f32
    %340 = vector.broadcast %cst_141 : f32 to vector<1x32xf32>
    %341 = arith.mulf %340, %253 : vector<1x32xf32>
    %342 = arith.addf %236, %341 : vector<1x32xf32>
    %cst_142 = arith.constant -5.000000e+00 : f32
    %cst_143 = arith.constant 5.000000e+00 : f32
    %343 = vector.broadcast %cst_142 : f32 to vector<1x32xf32>
    %344 = arith.maximumf %343, %342 : vector<1x32xf32>
    %345 = vector.broadcast %cst_143 : f32 to vector<1x32xf32>
    %346 = arith.minimumf %345, %344 : vector<1x32xf32>
    %cst_144 = arith.constant 0.899999976 : f32
    %347 = vector.broadcast %cst_144 : f32 to vector<1x32xf32>
    %348 = arith.mulf %347, %346 : vector<1x32xf32>
    %cst_145 = arith.constant 1.000000e-01 : f32
    %349 = vector.broadcast %cst_145 : f32 to vector<1x32xf32>
    %350 = arith.mulf %349, %236 : vector<1x32xf32>
    %351 = arith.addf %348, %350 : vector<1x32xf32>
    %352 = arith.mulf %23, %322 : vector<1x32xf32>
    %353 = arith.mulf %22, %253 : vector<1x32xf32>
    %354 = arith.subf %352, %353 : vector<1x32xf32>
    %355 = arith.mulf %18, %236 : vector<1x32xf32>
    %356 = arith.subf %354, %355 : vector<1x32xf32>
    %cst_146 = arith.constant 5.000000e-01 : f32
    %357 = vector.broadcast %cst_146 : f32 to vector<1x32xf32>
    %358 = arith.mulf %357, %356 : vector<1x32xf32>
    %359 = arith.addf %253, %358 : vector<1x32xf32>
    %cst_147 = arith.constant -5.000000e+00 : f32
    %cst_148 = arith.constant 5.000000e+00 : f32
    %360 = vector.broadcast %cst_147 : f32 to vector<1x32xf32>
    %361 = arith.maximumf %360, %359 : vector<1x32xf32>
    %362 = vector.broadcast %cst_148 : f32 to vector<1x32xf32>
    %363 = arith.minimumf %362, %361 : vector<1x32xf32>
    %cst_149 = arith.constant 0.899999976 : f32
    %364 = vector.broadcast %cst_149 : f32 to vector<1x32xf32>
    %365 = arith.mulf %364, %363 : vector<1x32xf32>
    %cst_150 = arith.constant 1.000000e-01 : f32
    %366 = vector.broadcast %cst_150 : f32 to vector<1x32xf32>
    %367 = arith.mulf %366, %253 : vector<1x32xf32>
    %368 = arith.addf %365, %367 : vector<1x32xf32>
    %c2_151 = arith.constant 2 : index
    %c0_152 = arith.constant 0 : index
    %369 = vector.load %arg16[%c2_151, %c0_152] : memref<8x32xf32, #tpu.memory_space<vmem>>, vector<1x32xf32>
    tpu.vector_store %arg16[%c2_151, %c0_152], %351 {strides = array<i32>} : memref<8x32xf32, #tpu.memory_space<vmem>>, vector<1x32xf32>,
    %c0_153 = arith.constant 0 : index
    %c3 = arith.constant 3 : index
    %c0_154 = arith.constant 0 : index
    %370 = vector.load %arg0[%c0_153, %c3, %c0_154] : memref<2x8x8xf32, #tpu.memory_space<vmem>>, vector<2x1x8xf32>
    %371 = vector.shape_cast %278 : vector<1x8xf32> to vector<1x1x8xf32>
    %372 = vector.broadcast %371 : vector<1x1x8xf32> to vector<2x1x8xf32>
    %373 = arith.subf %372, %370 : vector<2x1x8xf32>
    %374 = arith.mulf %373, %373 : vector<2x1x8xf32>
    %375 = arith.addf %260, %374 : vector<2x1x8xf32>
    %376 = arith.subf %322, %310 : vector<1x32xf32>
    %377 = arith.mulf %376, %376 : vector<1x32xf32>
    %378 = arith.addf %266, %377 : vector<1x32xf32>
    %379 = arith.subf %351, %322 : vector<1x32xf32>
    %380 = arith.mulf %379, %379 : vector<1x32xf32>
    %381 = arith.addf %378, %380 : vector<1x32xf32>
    %cst_155 = arith.constant 5.000000e-01 : f32
    %382 = vector.broadcast %cst_155 : f32 to vector<1x8xf32>
    %383 = arith.mulf %382, %308 : vector<1x8xf32>
    %384 = arith.addf %278, %383 : vector<1x8xf32>
    %cst_156 = arith.constant -5.000000e+00 : f32
    %cst_157 = arith.constant 5.000000e+00 : f32
    %385 = vector.broadcast %cst_156 : f32 to vector<1x8xf32>
    %386 = arith.maximumf %385, %384 : vector<1x8xf32>
    %387 = vector.broadcast %cst_157 : f32 to vector<1x8xf32>
    %388 = arith.minimumf %387, %386 : vector<1x8xf32>
    %cst_158 = arith.constant 0.899999976 : f32
    %389 = vector.broadcast %cst_158 : f32 to vector<1x8xf32>
    %390 = arith.mulf %389, %388 : vector<1x8xf32>
    %cst_159 = arith.constant 1.000000e-01 : f32
    %391 = vector.broadcast %cst_159 : f32 to vector<1x8xf32>
    %392 = arith.mulf %391, %278 : vector<1x8xf32>
    %393 = arith.addf %390, %392 : vector<1x8xf32>
    %394 = vector.shape_cast %7 : vector<1x8xf32> to vector<1x1x8xf32>
    %395 = vector.broadcast %394 : vector<1x1x8xf32> to vector<2x1x8xf32>
    %396 = arith.mulf %395, %370 : vector<2x1x8xf32>
    %397 = arith.mulf %6, %308 : vector<1x8xf32>
    %398 = vector.shape_cast %397 : vector<1x8xf32> to vector<1x1x8xf32>
    %399 = vector.broadcast %398 : vector<1x1x8xf32> to vector<2x1x8xf32>
    %400 = arith.subf %396, %399 : vector<2x1x8xf32>
    %401 = arith.mulf %2, %278 : vector<1x8xf32>
    %402 = vector.shape_cast %401 : vector<1x8xf32> to vector<1x1x8xf32>
    %403 = vector.broadcast %402 : vector<1x1x8xf32> to vector<2x1x8xf32>
    %404 = arith.subf %400, %403 : vector<2x1x8xf32>
    %cst_160 = arith.constant 5.000000e-01 : f32
    %405 = vector.broadcast %cst_160 : f32 to vector<2x1x8xf32>
    %406 = arith.mulf %405, %404 : vector<2x1x8xf32>
    %407 = vector.shape_cast %308 : vector<1x8xf32> to vector<1x1x8xf32>
    %408 = vector.broadcast %407 : vector<1x1x8xf32> to vector<2x1x8xf32>
    %409 = arith.addf %408, %406 : vector<2x1x8xf32>
    %cst_161 = arith.constant -5.000000e+00 : f32
    %cst_162 = arith.constant 5.000000e+00 : f32
    %410 = vector.broadcast %cst_161 : f32 to vector<2x1x8xf32>
    %411 = arith.maximumf %410, %409 : vector<2x1x8xf32>
    %412 = vector.broadcast %cst_162 : f32 to vector<2x1x8xf32>
    %413 = arith.minimumf %412, %411 : vector<2x1x8xf32>
    %cst_163 = arith.constant 0.899999976 : f32
    %414 = vector.broadcast %cst_163 : f32 to vector<2x1x8xf32>
    %415 = arith.mulf %414, %413 : vector<2x1x8xf32>
    %cst_164 = arith.constant 1.000000e-01 : f32
    %416 = vector.broadcast %cst_164 : f32 to vector<1x8xf32>
    %417 = arith.mulf %416, %308 : vector<1x8xf32>
    %418 = vector.shape_cast %417 : vector<1x8xf32> to vector<1x1x8xf32>
    %419 = vector.broadcast %418 : vector<1x1x8xf32> to vector<2x1x8xf32>
    %420 = arith.addf %415, %419 : vector<2x1x8xf32>
    %cst_165 = arith.constant dense<0.000000e+00> : vector<1x8xf32>
    %421 = vector.multi_reduction <add>, %420, %cst_165 [0] : vector<2x1x8xf32> to vector<1x8xf32>
    %cst_166 = arith.constant 2.000000e+00 : f32
    %422 = vector.broadcast %cst_166 : f32 to vector<1x8xf32>
    %423 = arith.divf %421, %422 : vector<1x8xf32>
    %cst_167 = arith.constant dense<0.000000e+00> : vector<1x32xf32>
    %424 = tpu.matmul %393, %24, %cst_167 {dimension_numbers = #tpu.dot_dimension_numbers<[1], [0], [0], [1], [0, 0, 1, 1], [], []>} : vector<1x8xf32>, vector<8x32xf32>, vector<1x32xf32> -> vector<1x32xf32>
    %425 = arith.addf %424, %25 : vector<1x32xf32>
    %cst_168 = arith.constant 5.000000e-01 : f32
    %426 = vector.broadcast %cst_168 : f32 to vector<1x32xf32>
    %427 = arith.mulf %426, %339 : vector<1x32xf32>
    %428 = arith.addf %322, %427 : vector<1x32xf32>
    %cst_169 = arith.constant -5.000000e+00 : f32
    %cst_170 = arith.constant 5.000000e+00 : f32
    %429 = vector.broadcast %cst_169 : f32 to vector<1x32xf32>
    %430 = arith.maximumf %429, %428 : vector<1x32xf32>
    %431 = vector.broadcast %cst_170 : f32 to vector<1x32xf32>
    %432 = arith.minimumf %431, %430 : vector<1x32xf32>
    %cst_171 = arith.constant 0.899999976 : f32
    %433 = vector.broadcast %cst_171 : f32 to vector<1x32xf32>
    %434 = arith.mulf %433, %432 : vector<1x32xf32>
    %cst_172 = arith.constant 1.000000e-01 : f32
    %435 = vector.broadcast %cst_172 : f32 to vector<1x32xf32>
    %436 = arith.mulf %435, %322 : vector<1x32xf32>
    %437 = arith.addf %434, %436 : vector<1x32xf32>
    %438 = arith.mulf %15, %425 : vector<1x32xf32>
    %439 = arith.mulf %14, %339 : vector<1x32xf32>
    %440 = arith.subf %438, %439 : vector<1x32xf32>
    %441 = arith.mulf %10, %322 : vector<1x32xf32>
    %442 = arith.subf %440, %441 : vector<1x32xf32>
    %cst_173 = arith.constant 5.000000e-01 : f32
    %443 = vector.broadcast %cst_173 : f32 to vector<1x32xf32>
    %444 = arith.mulf %443, %442 : vector<1x32xf32>
    %445 = arith.addf %339, %444 : vector<1x32xf32>
    %cst_174 = arith.constant -5.000000e+00 : f32
    %cst_175 = arith.constant 5.000000e+00 : f32
    %446 = vector.broadcast %cst_174 : f32 to vector<1x32xf32>
    %447 = arith.maximumf %446, %445 : vector<1x32xf32>
    %448 = vector.broadcast %cst_175 : f32 to vector<1x32xf32>
    %449 = arith.minimumf %448, %447 : vector<1x32xf32>
    %cst_176 = arith.constant 0.899999976 : f32
    %450 = vector.broadcast %cst_176 : f32 to vector<1x32xf32>
    %451 = arith.mulf %450, %449 : vector<1x32xf32>
    %cst_177 = arith.constant 1.000000e-01 : f32
    %452 = vector.broadcast %cst_177 : f32 to vector<1x32xf32>
    %453 = arith.mulf %452, %339 : vector<1x32xf32>
    %454 = arith.addf %451, %453 : vector<1x32xf32>
    %cst_178 = arith.constant 5.000000e-01 : f32
    %455 = vector.broadcast %cst_178 : f32 to vector<1x32xf32>
    %456 = arith.mulf %455, %368 : vector<1x32xf32>
    %457 = arith.addf %351, %456 : vector<1x32xf32>
    %cst_179 = arith.constant -5.000000e+00 : f32
    %cst_180 = arith.constant 5.000000e+00 : f32
    %458 = vector.broadcast %cst_179 : f32 to vector<1x32xf32>
    %459 = arith.maximumf %458, %457 : vector<1x32xf32>
    %460 = vector.broadcast %cst_180 : f32 to vector<1x32xf32>
    %461 = arith.minimumf %460, %459 : vector<1x32xf32>
    %cst_181 = arith.constant 0.899999976 : f32
    %462 = vector.broadcast %cst_181 : f32 to vector<1x32xf32>
    %463 = arith.mulf %462, %461 : vector<1x32xf32>
    %cst_182 = arith.constant 1.000000e-01 : f32
    %464 = vector.broadcast %cst_182 : f32 to vector<1x32xf32>
    %465 = arith.mulf %464, %351 : vector<1x32xf32>
    %466 = arith.addf %463, %465 : vector<1x32xf32>
    %467 = arith.mulf %23, %437 : vector<1x32xf32>
    %468 = arith.mulf %22, %368 : vector<1x32xf32>
    %469 = arith.subf %467, %468 : vector<1x32xf32>
    %470 = arith.mulf %18, %351 : vector<1x32xf32>
    %471 = arith.subf %469, %470 : vector<1x32xf32>
    %cst_183 = arith.constant 5.000000e-01 : f32
    %472 = vector.broadcast %cst_183 : f32 to vector<1x32xf32>
    %473 = arith.mulf %472, %471 : vector<1x32xf32>
    %474 = arith.addf %368, %473 : vector<1x32xf32>
    %cst_184 = arith.constant -5.000000e+00 : f32
    %cst_185 = arith.constant 5.000000e+00 : f32
    %475 = vector.broadcast %cst_184 : f32 to vector<1x32xf32>
    %476 = arith.maximumf %475, %474 : vector<1x32xf32>
    %477 = vector.broadcast %cst_185 : f32 to vector<1x32xf32>
    %478 = arith.minimumf %477, %476 : vector<1x32xf32>
    %cst_186 = arith.constant 0.899999976 : f32
    %479 = vector.broadcast %cst_186 : f32 to vector<1x32xf32>
    %480 = arith.mulf %479, %478 : vector<1x32xf32>
    %cst_187 = arith.constant 1.000000e-01 : f32
    %481 = vector.broadcast %cst_187 : f32 to vector<1x32xf32>
    %482 = arith.mulf %481, %368 : vector<1x32xf32>
    %483 = arith.addf %480, %482 : vector<1x32xf32>
    %c3_188 = arith.constant 3 : index
    %c0_189 = arith.constant 0 : index
    %484 = vector.load %arg16[%c3_188, %c0_189] : memref<8x32xf32, #tpu.memory_space<vmem>>, vector<1x32xf32>
    tpu.vector_store %arg16[%c3_188, %c0_189], %466 {strides = array<i32>} : memref<8x32xf32, #tpu.memory_space<vmem>>, vector<1x32xf32>,
    %c0_190 = arith.constant 0 : index
    %c4 = arith.constant 4 : index
    %c0_191 = arith.constant 0 : index
    %485 = vector.load %arg0[%c0_190, %c4, %c0_191] : memref<2x8x8xf32, #tpu.memory_space<vmem>>, vector<2x1x8xf32>
    %486 = vector.shape_cast %393 : vector<1x8xf32> to vector<1x1x8xf32>
    %487 = vector.broadcast %486 : vector<1x1x8xf32> to vector<2x1x8xf32>
    %488 = arith.subf %487, %485 : vector<2x1x8xf32>
    %489 = arith.mulf %488, %488 : vector<2x1x8xf32>
    %490 = arith.addf %375, %489 : vector<2x1x8xf32>
    %491 = arith.subf %437, %425 : vector<1x32xf32>
    %492 = arith.mulf %491, %491 : vector<1x32xf32>
    %493 = arith.addf %381, %492 : vector<1x32xf32>
    %494 = arith.subf %466, %437 : vector<1x32xf32>
    %495 = arith.mulf %494, %494 : vector<1x32xf32>
    %496 = arith.addf %493, %495 : vector<1x32xf32>
    %cst_192 = arith.constant 5.000000e-01 : f32
    %497 = vector.broadcast %cst_192 : f32 to vector<1x8xf32>
    %498 = arith.mulf %497, %423 : vector<1x8xf32>
    %499 = arith.addf %393, %498 : vector<1x8xf32>
    %cst_193 = arith.constant -5.000000e+00 : f32
    %cst_194 = arith.constant 5.000000e+00 : f32
    %500 = vector.broadcast %cst_193 : f32 to vector<1x8xf32>
    %501 = arith.maximumf %500, %499 : vector<1x8xf32>
    %502 = vector.broadcast %cst_194 : f32 to vector<1x8xf32>
    %503 = arith.minimumf %502, %501 : vector<1x8xf32>
    %cst_195 = arith.constant 0.899999976 : f32
    %504 = vector.broadcast %cst_195 : f32 to vector<1x8xf32>
    %505 = arith.mulf %504, %503 : vector<1x8xf32>
    %cst_196 = arith.constant 1.000000e-01 : f32
    %506 = vector.broadcast %cst_196 : f32 to vector<1x8xf32>
    %507 = arith.mulf %506, %393 : vector<1x8xf32>
    %508 = arith.addf %505, %507 : vector<1x8xf32>
    %509 = vector.shape_cast %7 : vector<1x8xf32> to vector<1x1x8xf32>
    %510 = vector.broadcast %509 : vector<1x1x8xf32> to vector<2x1x8xf32>
    %511 = arith.mulf %510, %485 : vector<2x1x8xf32>
    %512 = arith.mulf %6, %423 : vector<1x8xf32>
    %513 = vector.shape_cast %512 : vector<1x8xf32> to vector<1x1x8xf32>
    %514 = vector.broadcast %513 : vector<1x1x8xf32> to vector<2x1x8xf32>
    %515 = arith.subf %511, %514 : vector<2x1x8xf32>
    %516 = arith.mulf %2, %393 : vector<1x8xf32>
    %517 = vector.shape_cast %516 : vector<1x8xf32> to vector<1x1x8xf32>
    %518 = vector.broadcast %517 : vector<1x1x8xf32> to vector<2x1x8xf32>
    %519 = arith.subf %515, %518 : vector<2x1x8xf32>
    %cst_197 = arith.constant 5.000000e-01 : f32
    %520 = vector.broadcast %cst_197 : f32 to vector<2x1x8xf32>
    %521 = arith.mulf %520, %519 : vector<2x1x8xf32>
    %522 = vector.shape_cast %423 : vector<1x8xf32> to vector<1x1x8xf32>
    %523 = vector.broadcast %522 : vector<1x1x8xf32> to vector<2x1x8xf32>
    %524 = arith.addf %523, %521 : vector<2x1x8xf32>
    %cst_198 = arith.constant -5.000000e+00 : f32
    %cst_199 = arith.constant 5.000000e+00 : f32
    %525 = vector.broadcast %cst_198 : f32 to vector<2x1x8xf32>
    %526 = arith.maximumf %525, %524 : vector<2x1x8xf32>
    %527 = vector.broadcast %cst_199 : f32 to vector<2x1x8xf32>
    %528 = arith.minimumf %527, %526 : vector<2x1x8xf32>
    %cst_200 = arith.constant 0.899999976 : f32
    %529 = vector.broadcast %cst_200 : f32 to vector<2x1x8xf32>
    %530 = arith.mulf %529, %528 : vector<2x1x8xf32>
    %cst_201 = arith.constant 1.000000e-01 : f32
    %531 = vector.broadcast %cst_201 : f32 to vector<1x8xf32>
    %532 = arith.mulf %531, %423 : vector<1x8xf32>
    %533 = vector.shape_cast %532 : vector<1x8xf32> to vector<1x1x8xf32>
    %534 = vector.broadcast %533 : vector<1x1x8xf32> to vector<2x1x8xf32>
    %535 = arith.addf %530, %534 : vector<2x1x8xf32>
    %cst_202 = arith.constant dense<0.000000e+00> : vector<1x8xf32>
    %536 = vector.multi_reduction <add>, %535, %cst_202 [0] : vector<2x1x8xf32> to vector<1x8xf32>
    %cst_203 = arith.constant 2.000000e+00 : f32
    %537 = vector.broadcast %cst_203 : f32 to vector<1x8xf32>
    %538 = arith.divf %536, %537 : vector<1x8xf32>
    %cst_204 = arith.constant dense<0.000000e+00> : vector<1x32xf32>
    %539 = tpu.matmul %508, %24, %cst_204 {dimension_numbers = #tpu.dot_dimension_numbers<[1], [0], [0], [1], [0, 0, 1, 1], [], []>} : vector<1x8xf32>, vector<8x32xf32>, vector<1x32xf32> -> vector<1x32xf32>
    %540 = arith.addf %539, %25 : vector<1x32xf32>
    %cst_205 = arith.constant 5.000000e-01 : f32
    %541 = vector.broadcast %cst_205 : f32 to vector<1x32xf32>
    %542 = arith.mulf %541, %454 : vector<1x32xf32>
    %543 = arith.addf %437, %542 : vector<1x32xf32>
    %cst_206 = arith.constant -5.000000e+00 : f32
    %cst_207 = arith.constant 5.000000e+00 : f32
    %544 = vector.broadcast %cst_206 : f32 to vector<1x32xf32>
    %545 = arith.maximumf %544, %543 : vector<1x32xf32>
    %546 = vector.broadcast %cst_207 : f32 to vector<1x32xf32>
    %547 = arith.minimumf %546, %545 : vector<1x32xf32>
    %cst_208 = arith.constant 0.899999976 : f32
    %548 = vector.broadcast %cst_208 : f32 to vector<1x32xf32>
    %549 = arith.mulf %548, %547 : vector<1x32xf32>
    %cst_209 = arith.constant 1.000000e-01 : f32
    %550 = vector.broadcast %cst_209 : f32 to vector<1x32xf32>
    %551 = arith.mulf %550, %437 : vector<1x32xf32>
    %552 = arith.addf %549, %551 : vector<1x32xf32>
    %553 = arith.mulf %15, %540 : vector<1x32xf32>
    %554 = arith.mulf %14, %454 : vector<1x32xf32>
    %555 = arith.subf %553, %554 : vector<1x32xf32>
    %556 = arith.mulf %10, %437 : vector<1x32xf32>
    %557 = arith.subf %555, %556 : vector<1x32xf32>
    %cst_210 = arith.constant 5.000000e-01 : f32
    %558 = vector.broadcast %cst_210 : f32 to vector<1x32xf32>
    %559 = arith.mulf %558, %557 : vector<1x32xf32>
    %560 = arith.addf %454, %559 : vector<1x32xf32>
    %cst_211 = arith.constant -5.000000e+00 : f32
    %cst_212 = arith.constant 5.000000e+00 : f32
    %561 = vector.broadcast %cst_211 : f32 to vector<1x32xf32>
    %562 = arith.maximumf %561, %560 : vector<1x32xf32>
    %563 = vector.broadcast %cst_212 : f32 to vector<1x32xf32>
    %564 = arith.minimumf %563, %562 : vector<1x32xf32>
    %cst_213 = arith.constant 0.899999976 : f32
    %565 = vector.broadcast %cst_213 : f32 to vector<1x32xf32>
    %566 = arith.mulf %565, %564 : vector<1x32xf32>
    %cst_214 = arith.constant 1.000000e-01 : f32
    %567 = vector.broadcast %cst_214 : f32 to vector<1x32xf32>
    %568 = arith.mulf %567, %454 : vector<1x32xf32>
    %569 = arith.addf %566, %568 : vector<1x32xf32>
    %cst_215 = arith.constant 5.000000e-01 : f32
    %570 = vector.broadcast %cst_215 : f32 to vector<1x32xf32>
    %571 = arith.mulf %570, %483 : vector<1x32xf32>
    %572 = arith.addf %466, %571 : vector<1x32xf32>
    %cst_216 = arith.constant -5.000000e+00 : f32
    %cst_217 = arith.constant 5.000000e+00 : f32
    %573 = vector.broadcast %cst_216 : f32 to vector<1x32xf32>
    %574 = arith.maximumf %573, %572 : vector<1x32xf32>
    %575 = vector.broadcast %cst_217 : f32 to vector<1x32xf32>
    %576 = arith.minimumf %575, %574 : vector<1x32xf32>
    %cst_218 = arith.constant 0.899999976 : f32
    %577 = vector.broadcast %cst_218 : f32 to vector<1x32xf32>
    %578 = arith.mulf %577, %576 : vector<1x32xf32>
    %cst_219 = arith.constant 1.000000e-01 : f32
    %579 = vector.broadcast %cst_219 : f32 to vector<1x32xf32>
    %580 = arith.mulf %579, %466 : vector<1x32xf32>
    %581 = arith.addf %578, %580 : vector<1x32xf32>
    %582 = arith.mulf %23, %552 : vector<1x32xf32>
    %583 = arith.mulf %22, %483 : vector<1x32xf32>
    %584 = arith.subf %582, %583 : vector<1x32xf32>
    %585 = arith.mulf %18, %466 : vector<1x32xf32>
    %586 = arith.subf %584, %585 : vector<1x32xf32>
    %cst_220 = arith.constant 5.000000e-01 : f32
    %587 = vector.broadcast %cst_220 : f32 to vector<1x32xf32>
    %588 = arith.mulf %587, %586 : vector<1x32xf32>
    %589 = arith.addf %483, %588 : vector<1x32xf32>
    %cst_221 = arith.constant -5.000000e+00 : f32
    %cst_222 = arith.constant 5.000000e+00 : f32
    %590 = vector.broadcast %cst_221 : f32 to vector<1x32xf32>
    %591 = arith.maximumf %590, %589 : vector<1x32xf32>
    %592 = vector.broadcast %cst_222 : f32 to vector<1x32xf32>
    %593 = arith.minimumf %592, %591 : vector<1x32xf32>
    %cst_223 = arith.constant 0.899999976 : f32
    %594 = vector.broadcast %cst_223 : f32 to vector<1x32xf32>
    %595 = arith.mulf %594, %593 : vector<1x32xf32>
    %cst_224 = arith.constant 1.000000e-01 : f32
    %596 = vector.broadcast %cst_224 : f32 to vector<1x32xf32>
    %597 = arith.mulf %596, %483 : vector<1x32xf32>
    %598 = arith.addf %595, %597 : vector<1x32xf32>
    %c4_225 = arith.constant 4 : index
    %c0_226 = arith.constant 0 : index
    %599 = vector.load %arg16[%c4_225, %c0_226] : memref<8x32xf32, #tpu.memory_space<vmem>>, vector<1x32xf32>
    tpu.vector_store %arg16[%c4_225, %c0_226], %581 {strides = array<i32>} : memref<8x32xf32, #tpu.memory_space<vmem>>, vector<1x32xf32>,
    %c0_227 = arith.constant 0 : index
    %c5 = arith.constant 5 : index
    %c0_228 = arith.constant 0 : index
    %600 = vector.load %arg0[%c0_227, %c5, %c0_228] : memref<2x8x8xf32, #tpu.memory_space<vmem>>, vector<2x1x8xf32>
    %601 = vector.shape_cast %508 : vector<1x8xf32> to vector<1x1x8xf32>
    %602 = vector.broadcast %601 : vector<1x1x8xf32> to vector<2x1x8xf32>
    %603 = arith.subf %602, %600 : vector<2x1x8xf32>
    %604 = arith.mulf %603, %603 : vector<2x1x8xf32>
    %605 = arith.addf %490, %604 : vector<2x1x8xf32>
    %606 = arith.subf %552, %540 : vector<1x32xf32>
    %607 = arith.mulf %606, %606 : vector<1x32xf32>
    %608 = arith.addf %496, %607 : vector<1x32xf32>
    %609 = arith.subf %581, %552 : vector<1x32xf32>
    %610 = arith.mulf %609, %609 : vector<1x32xf32>
    %611 = arith.addf %608, %610 : vector<1x32xf32>
    %cst_229 = arith.constant 5.000000e-01 : f32
    %612 = vector.broadcast %cst_229 : f32 to vector<1x8xf32>
    %613 = arith.mulf %612, %538 : vector<1x8xf32>
    %614 = arith.addf %508, %613 : vector<1x8xf32>
    %cst_230 = arith.constant -5.000000e+00 : f32
    %cst_231 = arith.constant 5.000000e+00 : f32
    %615 = vector.broadcast %cst_230 : f32 to vector<1x8xf32>
    %616 = arith.maximumf %615, %614 : vector<1x8xf32>
    %617 = vector.broadcast %cst_231 : f32 to vector<1x8xf32>
    %618 = arith.minimumf %617, %616 : vector<1x8xf32>
    %cst_232 = arith.constant 0.899999976 : f32
    %619 = vector.broadcast %cst_232 : f32 to vector<1x8xf32>
    %620 = arith.mulf %619, %618 : vector<1x8xf32>
    %cst_233 = arith.constant 1.000000e-01 : f32
    %621 = vector.broadcast %cst_233 : f32 to vector<1x8xf32>
    %622 = arith.mulf %621, %508 : vector<1x8xf32>
    %623 = arith.addf %620, %622 : vector<1x8xf32>
    %624 = vector.shape_cast %7 : vector<1x8xf32> to vector<1x1x8xf32>
    %625 = vector.broadcast %624 : vector<1x1x8xf32> to vector<2x1x8xf32>
    %626 = arith.mulf %625, %600 : vector<2x1x8xf32>
    %627 = arith.mulf %6, %538 : vector<1x8xf32>
    %628 = vector.shape_cast %627 : vector<1x8xf32> to vector<1x1x8xf32>
    %629 = vector.broadcast %628 : vector<1x1x8xf32> to vector<2x1x8xf32>
    %630 = arith.subf %626, %629 : vector<2x1x8xf32>
    %631 = arith.mulf %2, %508 : vector<1x8xf32>
    %632 = vector.shape_cast %631 : vector<1x8xf32> to vector<1x1x8xf32>
    %633 = vector.broadcast %632 : vector<1x1x8xf32> to vector<2x1x8xf32>
    %634 = arith.subf %630, %633 : vector<2x1x8xf32>
    %cst_234 = arith.constant 5.000000e-01 : f32
    %635 = vector.broadcast %cst_234 : f32 to vector<2x1x8xf32>
    %636 = arith.mulf %635, %634 : vector<2x1x8xf32>
    %637 = vector.shape_cast %538 : vector<1x8xf32> to vector<1x1x8xf32>
    %638 = vector.broadcast %637 : vector<1x1x8xf32> to vector<2x1x8xf32>
    %639 = arith.addf %638, %636 : vector<2x1x8xf32>
    %cst_235 = arith.constant -5.000000e+00 : f32
    %cst_236 = arith.constant 5.000000e+00 : f32
    %640 = vector.broadcast %cst_235 : f32 to vector<2x1x8xf32>
    %641 = arith.maximumf %640, %639 : vector<2x1x8xf32>
    %642 = vector.broadcast %cst_236 : f32 to vector<2x1x8xf32>
    %643 = arith.minimumf %642, %641 : vector<2x1x8xf32>
    %cst_237 = arith.constant 0.899999976 : f32
    %644 = vector.broadcast %cst_237 : f32 to vector<2x1x8xf32>
    %645 = arith.mulf %644, %643 : vector<2x1x8xf32>
    %cst_238 = arith.constant 1.000000e-01 : f32
    %646 = vector.broadcast %cst_238 : f32 to vector<1x8xf32>
    %647 = arith.mulf %646, %538 : vector<1x8xf32>
    %648 = vector.shape_cast %647 : vector<1x8xf32> to vector<1x1x8xf32>
    %649 = vector.broadcast %648 : vector<1x1x8xf32> to vector<2x1x8xf32>
    %650 = arith.addf %645, %649 : vector<2x1x8xf32>
    %cst_239 = arith.constant dense<0.000000e+00> : vector<1x8xf32>
    %651 = vector.multi_reduction <add>, %650, %cst_239 [0] : vector<2x1x8xf32> to vector<1x8xf32>
    %cst_240 = arith.constant 2.000000e+00 : f32
    %652 = vector.broadcast %cst_240 : f32 to vector<1x8xf32>
    %653 = arith.divf %651, %652 : vector<1x8xf32>
    %cst_241 = arith.constant dense<0.000000e+00> : vector<1x32xf32>
    %654 = tpu.matmul %623, %24, %cst_241 {dimension_numbers = #tpu.dot_dimension_numbers<[1], [0], [0], [1], [0, 0, 1, 1], [], []>} : vector<1x8xf32>, vector<8x32xf32>, vector<1x32xf32> -> vector<1x32xf32>
    %655 = arith.addf %654, %25 : vector<1x32xf32>
    %cst_242 = arith.constant 5.000000e-01 : f32
    %656 = vector.broadcast %cst_242 : f32 to vector<1x32xf32>
    %657 = arith.mulf %656, %569 : vector<1x32xf32>
    %658 = arith.addf %552, %657 : vector<1x32xf32>
    %cst_243 = arith.constant -5.000000e+00 : f32
    %cst_244 = arith.constant 5.000000e+00 : f32
    %659 = vector.broadcast %cst_243 : f32 to vector<1x32xf32>
    %660 = arith.maximumf %659, %658 : vector<1x32xf32>
    %661 = vector.broadcast %cst_244 : f32 to vector<1x32xf32>
    %662 = arith.minimumf %661, %660 : vector<1x32xf32>
    %cst_245 = arith.constant 0.899999976 : f32
    %663 = vector.broadcast %cst_245 : f32 to vector<1x32xf32>
    %664 = arith.mulf %663, %662 : vector<1x32xf32>
    %cst_246 = arith.constant 1.000000e-01 : f32
    %665 = vector.broadcast %cst_246 : f32 to vector<1x32xf32>
    %666 = arith.mulf %665, %552 : vector<1x32xf32>
    %667 = arith.addf %664, %666 : vector<1x32xf32>
    %668 = arith.mulf %15, %655 : vector<1x32xf32>
    %669 = arith.mulf %14, %569 : vector<1x32xf32>
    %670 = arith.subf %668, %669 : vector<1x32xf32>
    %671 = arith.mulf %10, %552 : vector<1x32xf32>
    %672 = arith.subf %670, %671 : vector<1x32xf32>
    %cst_247 = arith.constant 5.000000e-01 : f32
    %673 = vector.broadcast %cst_247 : f32 to vector<1x32xf32>
    %674 = arith.mulf %673, %672 : vector<1x32xf32>
    %675 = arith.addf %569, %674 : vector<1x32xf32>
    %cst_248 = arith.constant -5.000000e+00 : f32
    %cst_249 = arith.constant 5.000000e+00 : f32
    %676 = vector.broadcast %cst_248 : f32 to vector<1x32xf32>
    %677 = arith.maximumf %676, %675 : vector<1x32xf32>
    %678 = vector.broadcast %cst_249 : f32 to vector<1x32xf32>
    %679 = arith.minimumf %678, %677 : vector<1x32xf32>
    %cst_250 = arith.constant 0.899999976 : f32
    %680 = vector.broadcast %cst_250 : f32 to vector<1x32xf32>
    %681 = arith.mulf %680, %679 : vector<1x32xf32>
    %cst_251 = arith.constant 1.000000e-01 : f32
    %682 = vector.broadcast %cst_251 : f32 to vector<1x32xf32>
    %683 = arith.mulf %682, %569 : vector<1x32xf32>
    %684 = arith.addf %681, %683 : vector<1x32xf32>
    %cst_252 = arith.constant 5.000000e-01 : f32
    %685 = vector.broadcast %cst_252 : f32 to vector<1x32xf32>
    %686 = arith.mulf %685, %598 : vector<1x32xf32>
    %687 = arith.addf %581, %686 : vector<1x32xf32>
    %cst_253 = arith.constant -5.000000e+00 : f32
    %cst_254 = arith.constant 5.000000e+00 : f32
    %688 = vector.broadcast %cst_253 : f32 to vector<1x32xf32>
    %689 = arith.maximumf %688, %687 : vector<1x32xf32>
    %690 = vector.broadcast %cst_254 : f32 to vector<1x32xf32>
    %691 = arith.minimumf %690, %689 : vector<1x32xf32>
    %cst_255 = arith.constant 0.899999976 : f32
    %692 = vector.broadcast %cst_255 : f32 to vector<1x32xf32>
    %693 = arith.mulf %692, %691 : vector<1x32xf32>
    %cst_256 = arith.constant 1.000000e-01 : f32
    %694 = vector.broadcast %cst_256 : f32 to vector<1x32xf32>
    %695 = arith.mulf %694, %581 : vector<1x32xf32>
    %696 = arith.addf %693, %695 : vector<1x32xf32>
    %697 = arith.mulf %23, %667 : vector<1x32xf32>
    %698 = arith.mulf %22, %598 : vector<1x32xf32>
    %699 = arith.subf %697, %698 : vector<1x32xf32>
    %700 = arith.mulf %18, %581 : vector<1x32xf32>
    %701 = arith.subf %699, %700 : vector<1x32xf32>
    %cst_257 = arith.constant 5.000000e-01 : f32
    %702 = vector.broadcast %cst_257 : f32 to vector<1x32xf32>
    %703 = arith.mulf %702, %701 : vector<1x32xf32>
    %704 = arith.addf %598, %703 : vector<1x32xf32>
    %cst_258 = arith.constant -5.000000e+00 : f32
    %cst_259 = arith.constant 5.000000e+00 : f32
    %705 = vector.broadcast %cst_258 : f32 to vector<1x32xf32>
    %706 = arith.maximumf %705, %704 : vector<1x32xf32>
    %707 = vector.broadcast %cst_259 : f32 to vector<1x32xf32>
    %708 = arith.minimumf %707, %706 : vector<1x32xf32>
    %cst_260 = arith.constant 0.899999976 : f32
    %709 = vector.broadcast %cst_260 : f32 to vector<1x32xf32>
    %710 = arith.mulf %709, %708 : vector<1x32xf32>
    %cst_261 = arith.constant 1.000000e-01 : f32
    %711 = vector.broadcast %cst_261 : f32 to vector<1x32xf32>
    %712 = arith.mulf %711, %598 : vector<1x32xf32>
    %713 = arith.addf %710, %712 : vector<1x32xf32>
    %c5_262 = arith.constant 5 : index
    %c0_263 = arith.constant 0 : index
    %714 = vector.load %arg16[%c5_262, %c0_263] : memref<8x32xf32, #tpu.memory_space<vmem>>, vector<1x32xf32>
    tpu.vector_store %arg16[%c5_262, %c0_263], %696 {strides = array<i32>} : memref<8x32xf32, #tpu.memory_space<vmem>>, vector<1x32xf32>,
    %c0_264 = arith.constant 0 : index
    %c6 = arith.constant 6 : index
    %c0_265 = arith.constant 0 : index
    %715 = vector.load %arg0[%c0_264, %c6, %c0_265] : memref<2x8x8xf32, #tpu.memory_space<vmem>>, vector<2x1x8xf32>
    %716 = vector.shape_cast %623 : vector<1x8xf32> to vector<1x1x8xf32>
    %717 = vector.broadcast %716 : vector<1x1x8xf32> to vector<2x1x8xf32>
    %718 = arith.subf %717, %715 : vector<2x1x8xf32>
    %719 = arith.mulf %718, %718 : vector<2x1x8xf32>
    %720 = arith.addf %605, %719 : vector<2x1x8xf32>
    %721 = arith.subf %667, %655 : vector<1x32xf32>
    %722 = arith.mulf %721, %721 : vector<1x32xf32>
    %723 = arith.addf %611, %722 : vector<1x32xf32>
    %724 = arith.subf %696, %667 : vector<1x32xf32>
    %725 = arith.mulf %724, %724 : vector<1x32xf32>
    %726 = arith.addf %723, %725 : vector<1x32xf32>
    %cst_266 = arith.constant 5.000000e-01 : f32
    %727 = vector.broadcast %cst_266 : f32 to vector<1x8xf32>
    %728 = arith.mulf %727, %653 : vector<1x8xf32>
    %729 = arith.addf %623, %728 : vector<1x8xf32>
    %cst_267 = arith.constant -5.000000e+00 : f32
    %cst_268 = arith.constant 5.000000e+00 : f32
    %730 = vector.broadcast %cst_267 : f32 to vector<1x8xf32>
    %731 = arith.maximumf %730, %729 : vector<1x8xf32>
    %732 = vector.broadcast %cst_268 : f32 to vector<1x8xf32>
    %733 = arith.minimumf %732, %731 : vector<1x8xf32>
    %cst_269 = arith.constant 0.899999976 : f32
    %734 = vector.broadcast %cst_269 : f32 to vector<1x8xf32>
    %735 = arith.mulf %734, %733 : vector<1x8xf32>
    %cst_270 = arith.constant 1.000000e-01 : f32
    %736 = vector.broadcast %cst_270 : f32 to vector<1x8xf32>
    %737 = arith.mulf %736, %623 : vector<1x8xf32>
    %738 = arith.addf %735, %737 : vector<1x8xf32>
    %cst_271 = arith.constant dense<0.000000e+00> : vector<1x32xf32>
    %739 = tpu.matmul %738, %24, %cst_271 {dimension_numbers = #tpu.dot_dimension_numbers<[1], [0], [0], [1], [0, 0, 1, 1], [], []>} : vector<1x8xf32>, vector<8x32xf32>, vector<1x32xf32> -> vector<1x32xf32>
    %740 = arith.addf %739, %25 : vector<1x32xf32>
    %cst_272 = arith.constant 5.000000e-01 : f32
    %741 = vector.broadcast %cst_272 : f32 to vector<1x32xf32>
    %742 = arith.mulf %741, %684 : vector<1x32xf32>
    %743 = arith.addf %667, %742 : vector<1x32xf32>
    %cst_273 = arith.constant -5.000000e+00 : f32
    %cst_274 = arith.constant 5.000000e+00 : f32
    %744 = vector.broadcast %cst_273 : f32 to vector<1x32xf32>
    %745 = arith.maximumf %744, %743 : vector<1x32xf32>
    %746 = vector.broadcast %cst_274 : f32 to vector<1x32xf32>
    %747 = arith.minimumf %746, %745 : vector<1x32xf32>
    %cst_275 = arith.constant 0.899999976 : f32
    %748 = vector.broadcast %cst_275 : f32 to vector<1x32xf32>
    %749 = arith.mulf %748, %747 : vector<1x32xf32>
    %cst_276 = arith.constant 1.000000e-01 : f32
    %750 = vector.broadcast %cst_276 : f32 to vector<1x32xf32>
    %751 = arith.mulf %750, %667 : vector<1x32xf32>
    %752 = arith.addf %749, %751 : vector<1x32xf32>
    %cst_277 = arith.constant 5.000000e-01 : f32
    %753 = vector.broadcast %cst_277 : f32 to vector<1x32xf32>
    %754 = arith.mulf %753, %713 : vector<1x32xf32>
    %755 = arith.addf %696, %754 : vector<1x32xf32>
    %cst_278 = arith.constant -5.000000e+00 : f32
    %cst_279 = arith.constant 5.000000e+00 : f32
    %756 = vector.broadcast %cst_278 : f32 to vector<1x32xf32>
    %757 = arith.maximumf %756, %755 : vector<1x32xf32>
    %758 = vector.broadcast %cst_279 : f32 to vector<1x32xf32>
    %759 = arith.minimumf %758, %757 : vector<1x32xf32>
    %cst_280 = arith.constant 0.899999976 : f32
    %760 = vector.broadcast %cst_280 : f32 to vector<1x32xf32>
    %761 = arith.mulf %760, %759 : vector<1x32xf32>
    %cst_281 = arith.constant 1.000000e-01 : f32
    %762 = vector.broadcast %cst_281 : f32 to vector<1x32xf32>
    %763 = arith.mulf %762, %696 : vector<1x32xf32>
    %764 = arith.addf %761, %763 : vector<1x32xf32>
    %765 = arith.mulf %23, %752 : vector<1x32xf32>
    %766 = arith.mulf %22, %713 : vector<1x32xf32>
    %767 = arith.subf %765, %766 : vector<1x32xf32>
    %768 = arith.mulf %18, %696 : vector<1x32xf32>
    %769 = arith.subf %767, %768 : vector<1x32xf32>
    %cst_282 = arith.constant 5.000000e-01 : f32
    %770 = vector.broadcast %cst_282 : f32 to vector<1x32xf32>
    %771 = arith.mulf %770, %769 : vector<1x32xf32>
    %772 = arith.addf %713, %771 : vector<1x32xf32>
    %cst_283 = arith.constant -5.000000e+00 : f32
    %cst_284 = arith.constant 5.000000e+00 : f32
    %773 = vector.broadcast %cst_283 : f32 to vector<1x32xf32>
    %774 = arith.maximumf %773, %772 : vector<1x32xf32>
    %775 = vector.broadcast %cst_284 : f32 to vector<1x32xf32>
    %776 = arith.minimumf %775, %774 : vector<1x32xf32>
    %cst_285 = arith.constant 0.899999976 : f32
    %777 = vector.broadcast %cst_285 : f32 to vector<1x32xf32>
    %778 = arith.mulf %777, %776 : vector<1x32xf32>
    %cst_286 = arith.constant 1.000000e-01 : f32
    %779 = vector.broadcast %cst_286 : f32 to vector<1x32xf32>
    %780 = arith.mulf %779, %713 : vector<1x32xf32>
    %781 = arith.addf %778, %780 : vector<1x32xf32>
    %c6_287 = arith.constant 6 : index
    %c0_288 = arith.constant 0 : index
    %782 = vector.load %arg16[%c6_287, %c0_288] : memref<8x32xf32, #tpu.memory_space<vmem>>, vector<1x32xf32>
    tpu.vector_store %arg16[%c6_287, %c0_288], %764 {strides = array<i32>} : memref<8x32xf32, #tpu.memory_space<vmem>>, vector<1x32xf32>,
    %c0_289 = arith.constant 0 : index
    %c7 = arith.constant 7 : index
    %c0_290 = arith.constant 0 : index
    %783 = vector.load %arg0[%c0_289, %c7, %c0_290] : memref<2x8x8xf32, #tpu.memory_space<vmem>>, vector<2x1x8xf32>
    %784 = vector.shape_cast %738 : vector<1x8xf32> to vector<1x1x8xf32>
    %785 = vector.broadcast %784 : vector<1x1x8xf32> to vector<2x1x8xf32>
    %786 = arith.subf %785, %783 : vector<2x1x8xf32>
    %787 = arith.mulf %786, %786 : vector<2x1x8xf32>
    %788 = arith.addf %720, %787 : vector<2x1x8xf32>
    %789 = arith.subf %752, %740 : vector<1x32xf32>
    %790 = arith.mulf %789, %789 : vector<1x32xf32>
    %791 = arith.addf %726, %790 : vector<1x32xf32>
    %792 = arith.subf %764, %752 : vector<1x32xf32>
    %793 = arith.mulf %792, %792 : vector<1x32xf32>
    %794 = arith.addf %791, %793 : vector<1x32xf32>
    %cst_291 = arith.constant 5.000000e-01 : f32
    %795 = vector.broadcast %cst_291 : f32 to vector<1x32xf32>
    %796 = arith.mulf %795, %781 : vector<1x32xf32>
    %797 = arith.addf %764, %796 : vector<1x32xf32>
    %cst_292 = arith.constant -5.000000e+00 : f32
    %cst_293 = arith.constant 5.000000e+00 : f32
    %798 = vector.broadcast %cst_292 : f32 to vector<1x32xf32>
    %799 = arith.maximumf %798, %797 : vector<1x32xf32>
    %800 = vector.broadcast %cst_293 : f32 to vector<1x32xf32>
    %801 = arith.minimumf %800, %799 : vector<1x32xf32>
    %cst_294 = arith.constant 0.899999976 : f32
    %802 = vector.broadcast %cst_294 : f32 to vector<1x32xf32>
    %803 = arith.mulf %802, %801 : vector<1x32xf32>
    %cst_295 = arith.constant 1.000000e-01 : f32
    %804 = vector.broadcast %cst_295 : f32 to vector<1x32xf32>
    %805 = arith.mulf %804, %764 : vector<1x32xf32>
    %806 = arith.addf %803, %805 : vector<1x32xf32>
    %c7_296 = arith.constant 7 : index
    %c0_297 = arith.constant 0 : index
    %807 = vector.load %arg16[%c7_296, %c0_297] : memref<8x32xf32, #tpu.memory_space<vmem>>, vector<1x32xf32>
    tpu.vector_store %arg16[%c7_296, %c0_297], %806 {strides = array<i32>} : memref<8x32xf32, #tpu.memory_space<vmem>>, vector<1x32xf32>,
    %c0_298 = arith.constant 0 : index
    %c0_299 = arith.constant 0 : index
    %808 = vector.load %arg16[%c0_298, %c0_299] : memref<8x32xf32, #tpu.memory_space<vmem>>, vector<8x32xf32>
    %cst_300 = arith.constant dense<0.000000e+00> : vector<8x8xf32>
    %809 = tpu.matmul %808, %26, %cst_300 {dimension_numbers = #tpu.dot_dimension_numbers<[1], [0], [0], [1], [0, 0, 1, 1], [], []>} : vector<8x32xf32>, vector<32x8xf32>, vector<8x8xf32> -> vector<8x8xf32>
    %810 = vector.broadcast %27 : vector<1x8xf32> to vector<8x8xf32>
    %811 = arith.addf %809, %810 : vector<8x8xf32>
    %812 = vector.shape_cast %811 : vector<8x8xf32> to vector<1x8x8xf32>
    %813 = vector.broadcast %812 : vector<1x8x8xf32> to vector<2x8x8xf32>
    %c0_301 = arith.constant 0 : index
    %c0_302 = arith.constant 0 : index
    %c0_303 = arith.constant 0 : index
    %814 = vector.load %arg14[%c0_301, %c0_302, %c0_303] : memref<2x8x8xf32, #tpu.memory_space<vmem>>, vector<2x8x8xf32>
    tpu.vector_store %arg14[%c0_301, %c0_302, %c0_303], %813 {strides = array<i32>} : memref<2x8x8xf32, #tpu.memory_space<vmem>>, vector<2x8x8xf32>,
    %cst_304 = arith.constant dense<0.000000e+00> : vector<1x8xf32>
    %815 = vector.multi_reduction <add>, %788, %cst_304 [0] : vector<2x1x8xf32> to vector<1x8xf32>
    %816 = vector.shape_cast %815 : vector<1x8xf32> to vector<1x1x8xf32>
    %cst_305 = arith.constant dense<0.000000e+00> : vector<1xf32>
    %817 = vector.multi_reduction <add>, %816, %cst_305 [1, 2] : vector<1x1x8xf32> to vector<1xf32>
    %818 = vector.shape_cast %817 : vector<1xf32> to vector<1x1x1xf32>
    %819 = vector.extract %818[0, 0, 0] : f32 from vector<1x1x1xf32>
    %820 = vector.broadcast %819 : f32 to vector<1x1xf32>
    %821 = vector.shape_cast %794 : vector<1x32xf32> to vector<1x1x32xf32>
    %cst_306 = arith.constant dense<0.000000e+00> : vector<1xf32>
    %822 = vector.multi_reduction <add>, %821, %cst_306 [1, 2] : vector<1x1x32xf32> to vector<1xf32>
    %823 = vector.shape_cast %822 : vector<1xf32> to vector<1x1x1xf32>
    %824 = vector.extract %823[0, 0, 0] : f32 from vector<1x1x1xf32>
    %825 = vector.broadcast %824 : f32 to vector<1x1xf32>
    %cst_307 = arith.constant 6.250000e-02 : f32
    %826 = vector.broadcast %cst_307 : f32 to vector<1x1xf32>
    %827 = arith.mulf %820, %826 : vector<1x1xf32>
    %cst_308 = arith.constant 3.125000e-02 : f32
    %828 = vector.broadcast %cst_308 : f32 to vector<1x1xf32>
    %829 = arith.mulf %825, %828 : vector<1x1xf32>
    %830 = arith.addf %827, %829 : vector<1x1xf32>
    %c0_309 = arith.constant 0 : index
    %c0_310 = arith.constant 0 : index
    %831 = vector.load %arg15[%c0_309, %c0_310] : memref<1x1xf32, #tpu.memory_space<vmem>>, vector<1x1xf32>
    tpu.vector_store %arg15[%c0_309, %c0_310], %830 {strides = array<i32>} : memref<1x1xf32, #tpu.memory_space<vmem>>, vector<1x1xf32>,
    return
  }
}

</mosaic_0001>

<bundles_post_ra>
// kernel: tpu_custom_call.1
= control target key start
LH: loop header
LB: loop body
LE: loop exit
PB: predicated region body
PF: predicated region fallthrough
CT: control target
= control target key end

     0   :  { %21 = vsyncpa [#allocation4], 0  ;;  %v1441_v2 = vmov 0.0   ;;  %vm1442_vm0 = vmmov 0   ;;  %s1944_s0 = inlined_call_operand.vmem [shape: f32[2,8,8], index: 0, kind: input, shape index: {}]   ;;  %s1945_s1 = inlined_call_operand.vmem [shape: f32[1,8], index: 1, kind: input, shape index: {}]   ;;  %s1946_s2 = inlined_call_operand.vmem [shape: f32[1,8], index: 2, kind: input, shape index: {}]   ;;  %s1947_s3 = inlined_call_operand.vmem [shape: f32[1,8], index: 3, kind: input, shape index: {}]   ;;  %s1948_s4 = inlined_call_operand.vmem [shape: f32[8,32], index: 4, kind: input, shape index: {}]   ;;  %s1949_s5 = inlined_call_operand.vmem [shape: f32[1,32], index: 5, kind: input, shape index: {}]   ;;  %s1950_s6 = inlined_call_operand.vmem [shape: f32[1,32], index: 6, kind: input, shape index: {}]   ;;  %s1951_s7 = inlined_call_operand.vmem [shape: f32[1,32], index: 7, kind: input, shape index: {}]   ;;  %s1952_s8 = inlined_call_operand.vmem [shape: f32[1,32], index: 8, kind: input, shape index: {}]   ;;  %s1953_s9 = inlined_call_operand.vmem [shape: f32[1,32], index: 9, kind: input, shape index: {}]   ;;  %s1954_s10 = inlined_call_operand.vmem [shape: f32[1,32], index: 10, kind: input, shape index: {}]   ;;  %s1955_s11 = inlined_call_operand.vmem [shape: f32[1,32], index: 11, kind: input, shape index: {}]   ;;  %s1956_s12 = inlined_call_operand.vmem [shape: f32[32,8], index: 12, kind: input, shape index: {}]   ;;  %s1957_s13 = inlined_call_operand.vmem [shape: f32[1,8], index: 13, kind: input, shape index: {}]   ;;  %s1958_s14 = inlined_call_operand.hbm [shape: f32[2,8,8], index: 14, kind: output, shape index: {0}]   ;;  %s1959_s15 = inlined_call_operand.hbm [shape: f32[1,1], index: 15, kind: output, shape index: {1}]  }
   0x1   :  { %v1530_v0 = vld [vmem:[%s1948_s4] sm:$0xff]  ;;  %1341 = vmatprep.subr.mxu0 %v1441_v2  ;;  %1343 = vmatprep.mubr.msk.f32.mxu0 %vm1442_vm0, %v1441_v2  ;;  %v77_v8 = vld [vmem:[%s1944_s0 + $0x8] sm:$0x1] }
   0x2   :  { %v51_v1 = vld [vmem:[%s1945_s1] sm:$0x1]  ;;  %1342 = vmatpush3.msra.mxu0 %v1530_v0  ;;  %1346 = vmatprep.subr.mxu1 %v1441_v2 }
   0x3   :  { %v53_v3 = vld [vmem:[%s1946_s2] sm:$0x1]  ;;  %v1551_v6 = vmul.f32 %v51_v1, %v51_v1  ;;  %1344 = vmatmul.mubr.f32.vlgmr.msra.gmra.mxu0 %v1441_v2  ;;  %1347 = vmatpush3.msra.mxu1 %v1530_v0 }
   0x4   :  { %v1544_v4 = vld [vmem:[%s1947_s3] sm:$0x1]  ;;  %v54_v7 = vand.u32 2147483647, %v53_v3  ;;  %1348 = vmatprep.mubr.msk.f32.mxu1 %vm1442_vm0, %v1441_v2  ;;  %1351 = vmatprep.subr.mxu0 %v1441_v2 }
   0x5   :  { %v76_v5 = vld [vmem:[%s1944_s0] sm:$0x1]  ;;  %v79_v11 = vmul.f32 %v77_v8, %v1544_v4  ;;  %1352 = vmatpush3.msra.mxu0 %v1530_v0  ;;  %1353 = vmatprep.mubr.msk.f32.mxu0 %vm1442_vm0, %v1441_v2  ;;  %v83_v13 = vmul.f32 0.0, %v1551_v6 }
   0x6   :  { %v1560_v9 = vmul.f32 2.0, %v54_v7  ;;  %v78_v10 = vmul.f32 %v76_v5, %v1544_v4  ;;  %1356 = vmatprep.subr.mxu1 %v1441_v2  ;;  %1361 = vmatprep.subr.mxu0 %v1441_v2 }
   0x8   :  { %v80_v12 = vmul.f32 0.0, %v1560_v9 }
   0x9   :  { %22 = vsyncpa [#allocation6], 0  ;;  %vm98_vm1 = vcmask 57344   ;;  %v1577_v26 = vld [vmem:[%s1944_s0 + $0x1] sm:$0x1]  ;;  %vm104_vm2 = vcmask 64512  }
   0xa   :  { %v81_v14 = vsub.f32 %v78_v10, %v80_v12  ;;  %v82_v15 = vsub.f32 %v79_v11, %v80_v12  ;;  %v1582_v27 = vld [vmem:[%s1944_s0 + $0x9] sm:$0x1]  ;;  %v220_v30 = vmul.f32 %v1577_v26, %v1544_v4  ;;  %v1602_v53 = vld [vmem:[%s1944_s0 + $0x2] sm:$0x1]  ;;  %v1607_v54 = vld [vmem:[%s1944_s0 + $0xa] sm:$0x1] }
   0xb   :  { %v221_v31 = vmul.f32 %v1582_v27, %v1544_v4  ;;  %v373_v57 = vmul.f32 %v1602_v53, %v1544_v4  ;;  %v374_v58 = vmul.f32 %v1607_v54, %v1544_v4  ;;  %vm200_vm3 = vcmask 253952  }
   0xc   :  { %v84_v16 = vsub.f32 %v81_v14, %v83_v13  ;;  %v85_v17 = vsub.f32 %v82_v15, %v83_v13  ;;  %201 = vst.msk [vmem:[#allocation2] sm:$0x1] %vm200_vm3, %v1441_v2  ;;  %vm1134_vm4 = vcmask 261120   ;;  %vm1238_vm5 = vcmask 0  }
   0xe   :  { %v86_v18 = vmul.f32 0.5, %v84_v16  ;;  %v87_v19 = vmul.f32 0.5, %v85_v17 }
  0x10   :  { %v1270_v20 = vclamps-f32 %v86_v18, 5.0  ;;  %v1271_v21 = vclamps-f32 %v87_v19, 5.0 }
  0x12   :  { %v94_v22 = vmul.f32 0.9, %v1270_v20  ;;  %v95_v23 = vmul.f32 0.9, %v1271_v21 }
  0x14   :  { %v99_v24 = vsel %vm98_vm1, %v94_v22, 0.0  ;;  %v100_v25 = vsel %vm98_vm1, %v95_v23, 0.0 }
  0x15   :  { %v101_v28 = vadd.f32 %v100_v25, %v99_v24  ;;  %v1631_v25 = vld [vmem:[%s1944_s0 + $0x3] sm:$0x1] }
  0x17   :  { %v103_v29 = vmul.f32 0.5, %v101_v28  ;;  %v1636_v28 = vld [vmem:[%s1944_s0 + $0xb] sm:$0x1] }
  0x19   :  { %v214_v32 = vmul.f32 0.5, %v103_v29  ;;  %v222_v33 = vmul.f32 %v103_v29, %v1560_v9  ;;  %v237_v46 = vmul.f32 0.1, %v103_v29 }
  0x1b   :  { %v1274_v34 = vclamps-f32 %v214_v32, 5.0  ;;  %v223_v35 = vsub.f32 %v220_v30, %v222_v33  ;;  %v224_v36 = vsub.f32 %v221_v31, %v222_v33  ;;  %v531_v31 = vmul.f32 %v1631_v25, %v1544_v4 }
  0x1c   :  { %v532_v32 = vmul.f32 %v1636_v28, %v1544_v4 }
  0x1d   :  { %v1589_v37 = vmul.f32 0.9, %v1274_v34  ;;  %v225_v38 = vsub.f32 %v223_v35, %v83_v13  ;;  %v226_v39 = vsub.f32 %v224_v36, %v83_v13 }
  0x1f   :  { %1349 = vmatmul.mubr.msk.f32.vlgmr.msra.gmra.mxu1 %vm104_vm2, %v1589_v37  ;;  %v227_v40 = vmul.f32 0.5, %v225_v38  ;;  %v228_v41 = vmul.f32 0.5, %v226_v39  ;;  %v378_v59 = vmul.f32 %v1589_v37, %v1551_v6  ;;  %v371_v5 = vmul.f32 0.1, %v1589_v37 }
  0x20   :  { %1357 = vmatpush3.msra.mxu1 %v1530_v0  ;;  %1358 = vmatprep.mubr.msk.f32.mxu1 %vm1442_vm0, %v1441_v2 }
  0x21   :  { %v229_v42 = vadd.f32 %v227_v40, %v103_v29  ;;  %v230_v43 = vadd.f32 %v228_v41, %v103_v29  ;;  %1366 = vmatprep.subr.mxu1 %v1441_v2 }
  0x23   :  { %v1275_v44 = vclamps-f32 %v229_v42, 5.0  ;;  %v1276_v45 = vclamps-f32 %v230_v43, 5.0 }
  0x25   :  { %v235_v47 = vmul.f32 0.9, %v1275_v44  ;;  %v236_v48 = vmul.f32 0.9, %v1276_v45 }
  0x27   :  { %v238_v49 = vadd.f32 %v237_v46, %v235_v47  ;;  %v239_v50 = vadd.f32 %v237_v46, %v236_v48 }
  0x29   :  { %v240_v51 = vsel %vm98_vm1, %v238_v49, 0.0  ;;  %v241_v52 = vsel %vm98_vm1, %v239_v50, 0.0 }
  0x2a   :  { %v242_v55 = vadd.f32 %v241_v52, %v240_v51 }
  0x2c   :  { %v243_v56 = vmul.f32 0.5, %v242_v55 }
  0x2e   :  { %v366_v60 = vmul.f32 0.5, %v243_v56  ;;  %v375_v61 = vmul.f32 %v243_v56, %v1560_v9  ;;  %v391_v18 = vmul.f32 0.1, %v243_v56 }
  0x30   :  { %v367_v62 = vadd.f32 %v366_v60, %v1589_v37  ;;  %v376_v63 = vsub.f32 %v373_v57, %v375_v61  ;;  %v377_v1 = vsub.f32 %v374_v58, %v375_v61  ;;  %v1660_v61 = vld [vmem:[%s1944_s0 + $0x4] sm:$0x1] }
  0x32   :  { %v1282_v3 = vclamps-f32 %v367_v62, 5.0  ;;  %v379_v7 = vsub.f32 %v376_v63, %v378_v59  ;;  %v380_v8 = vsub.f32 %v377_v1, %v378_v59  ;;  %v1665_v62 = vld [vmem:[%s1944_s0 + $0xc] sm:$0x1] }
  0x34   :  { %v370_v10 = vmul.f32 0.9, %v1282_v3  ;;  %v381_v11 = vmul.f32 0.5, %v379_v7  ;;  %v382_v12 = vmul.f32 0.5, %v380_v8  ;;  %v689_v3 = vmul.f32 %v1660_v61, %v1544_v4 }
  0x36   :  { %v1618_v13 = vadd.f32 %v371_v5, %v370_v10  ;;  %v383_v14 = vadd.f32 %v381_v11, %v243_v56  ;;  %v384_v15 = vadd.f32 %v382_v12, %v243_v56  ;;  %v690_v5 = vmul.f32 %v1665_v62, %v1544_v4 }
  0x38   :  { %1354 = vmatmul.mubr.msk.f32.vlgmr.msra.gmra.mxu0 %vm104_vm2, %v1618_v13  ;;  %v1283_v16 = vclamps-f32 %v383_v14, 5.0  ;;  %v1284_v17 = vclamps-f32 %v384_v15, 5.0  ;;  %v536_v33 = vmul.f32 %v1618_v13, %v1551_v6  ;;  %v529_v41 = vmul.f32 0.1, %v1618_v13 }
  0x39   :  { %1362 = vmatpush3.msra.mxu0 %v1530_v0  ;;  %1363 = vmatprep.mubr.msk.f32.mxu0 %vm1442_vm0, %v1441_v2 }
  0x3a   :  { %v389_v19 = vmul.f32 0.9, %v1283_v16  ;;  %v390_v20 = vmul.f32 0.9, %v1284_v17  ;;  %1371 = vmatprep.subr.mxu0 %v1441_v2 }
  0x3c   :  { %v392_v21 = vadd.f32 %v391_v18, %v389_v19  ;;  %v393_v22 = vadd.f32 %v391_v18, %v390_v20 }
  0x3e   :  { %v394_v23 = vsel %vm98_vm1, %v392_v21, 0.0  ;;  %v395_v24 = vsel %vm98_vm1, %v393_v22, 0.0 }
  0x3f   :  { %v396_v29 = vadd.f32 %v395_v24, %v394_v23 }
  0x41   :  { %v397_v30 = vmul.f32 0.5, %v396_v29 }
  0x43   :  { %v524_v34 = vmul.f32 0.5, %v397_v30  ;;  %v533_v35 = vmul.f32 %v397_v30, %v1560_v9  ;;  %v549_v52 = vmul.f32 0.1, %v397_v30 }
  0x45   :  { %v525_v36 = vadd.f32 %v524_v34, %v1618_v13  ;;  %v534_v38 = vsub.f32 %v531_v31, %v533_v35  ;;  %v535_v39 = vsub.f32 %v532_v32, %v533_v35 }
  0x47   :  { %v1290_v40 = vclamps-f32 %v525_v36, 5.0  ;;  %v537_v42 = vsub.f32 %v534_v38, %v536_v33  ;;  %v538_v43 = vsub.f32 %v535_v39, %v536_v33  ;;  %v1688_v39 = vld [vmem:[%s1944_s0 + $0x5] sm:$0x1] }
  0x49   :  { %v528_v44 = vmul.f32 0.9, %v1290_v40  ;;  %v539_v45 = vmul.f32 0.5, %v537_v42  ;;  %v540_v46 = vmul.f32 0.5, %v538_v43  ;;  %v847_v42 = vmul.f32 %v1688_v39, %v1544_v4 }
  0x4b   :  { %v1647_v47 = vadd.f32 %v529_v41, %v528_v44  ;;  %v541_v48 = vadd.f32 %v539_v45, %v397_v30  ;;  %v542_v49 = vadd.f32 %v540_v46, %v397_v30 }
  0x4d   :  { %1359 = vmatmul.mubr.msk.f32.vlgmr.msra.gmra.mxu1 %vm104_vm2, %v1647_v47  ;;  %v1291_v50 = vclamps-f32 %v541_v48, 5.0  ;;  %v1292_v51 = vclamps-f32 %v542_v49, 5.0  ;;  %v694_v7 = vmul.f32 %v1647_v47, %v1551_v6  ;;  %v687_v16 = vmul.f32 0.1, %v1647_v47 }
  0x4e   :  { %1367 = vmatpush3.msra.mxu1 %v1530_v0  ;;  %1368 = vmatprep.mubr.msk.f32.mxu1 %vm1442_vm0, %v1441_v2 }
  0x4f   :  { %v547_v55 = vmul.f32 0.9, %v1291_v50  ;;  %v548_v56 = vmul.f32 0.9, %v1292_v51  ;;  %1376 = vmatprep.subr.mxu1 %v1441_v2  ;;  %v65_v51 = vld [vmem:[%s1954_s10] sm:$0x1] }
  0x50   :  { %s1443_s10 = smov [#allocation5]  }
  0x51   :  { %v550_v57 = vadd.f32 %v549_v52, %v547_v55  ;;  %v551_v58 = vadd.f32 %v549_v52, %v548_v56  ;;  %s1258_s16 = sshll.u32 %s1443_s10, 4  ;;  %s1259_s16 = int_to_ptr.vmem [resolvable:$true] %s1258_s16 }
  0x52   :  { %p1402_p1 = scmp.lt.s32.totalorder %s1259_s16, %s1259_s16 }
  0x53   :  { %v552_v59 = vsel %vm98_vm1, %v550_v57, 0.0  ;;  %v553_v60 = vsel %vm98_vm1, %v551_v58, 0.0 }
  0x54   :  { %v554_v63 = vadd.f32 %v553_v60, %v552_v59 }
  0x56   :  { %v555_v1 = vmul.f32 0.5, %v554_v63 }
  0x58   :  { %v682_v8 = vmul.f32 0.5, %v555_v1  ;;  %v691_v10 = vmul.f32 %v555_v1, %v1560_v9  ;;  %v707_v31 = vmul.f32 0.1, %v555_v1 }
  0x5a   :  { %v683_v11 = vadd.f32 %v682_v8, %v1647_v47  ;;  %v692_v12 = vsub.f32 %v689_v3, %v691_v10  ;;  %v693_v14 = vsub.f32 %v690_v5, %v691_v10  ;;  %v63_v10 = vld [vmem:[%s1953_s9] sm:$0x1]  ;;  %s1397_s9 = scalar_lea.vmem %s1259_s16, 16 }
  0x5b   :  { %p1398_p0 = scmp.ne.s32.totalorder %s1259_s16, %s1397_s9 }
  0x5c   :  { %v1298_v15 = vclamps-f32 %v683_v11, 5.0  ;;  %v695_v17 = vsub.f32 %v692_v12, %v694_v7  ;;  %v696_v18 = vsub.f32 %v693_v14, %v694_v7  ;;  %v1723_v14 = vmul.f32 %v63_v10, %v63_v10 }
  0x5e   :  { %v686_v19 = vmul.f32 0.9, %v1298_v15  ;;  %v697_v20 = vmul.f32 0.5, %v695_v17  ;;  %v698_v21 = vmul.f32 0.5, %v696_v18 }
  0x60   :  { %v1676_v22 = vadd.f32 %v687_v16, %v686_v19  ;;  %v699_v23 = vadd.f32 %v697_v20, %v555_v1  ;;  %v700_v24 = vadd.f32 %v698_v21, %v555_v1  ;;  %v1712_v1 = vld [vmem:[%s1955_s11] sm:$0x1]  ;;  %s1401_s11 = scalar_lea.vmem %s1259_s16, 32 }
  0x61   :  { %v189_v15 = vmul.f32 0.0, %v1712_v1  ;;  %p1403_p2 = scmp.lt.s32.totalorder %s1401_s11, %s1397_s9 }
  0x62   :  { %1364 = vmatmul.mubr.msk.f32.vlgmr.msra.gmra.mxu0 %vm104_vm2, %v1676_v22  ;;  %v1299_v29 = vclamps-f32 %v699_v23, 5.0  ;;  %v1300_v30 = vclamps-f32 %v700_v24, 5.0  ;;  %v852_v46 = vmul.f32 %v1676_v22, %v1551_v6  ;;  %v845_v55 = vmul.f32 0.1, %v1676_v22 }
  0x63   :  { %1372 = vmatpush3.msra.mxu0 %v1530_v0  ;;  %1373 = vmatprep.mubr.msk.f32.mxu0 %vm1442_vm0, %v1441_v2  ;;  %v1693_v0 = vld [vmem:[%s1944_s0 + $0xd] sm:$0x1]  ;;  %v1730_v24 = vmul.f32 0.0, %v1723_v14  ;;  %p1404_p3 = por %p1403_p2, %p1402_p1 }
  0x64   :  { %v705_v32 = vmul.f32 0.9, %v1299_v29  ;;  %v706_v33 = vmul.f32 0.9, %v1300_v30  ;;  %v848_v43 = vmul.f32 %v1693_v0, %v1544_v4  ;;  %v66_v4 = vand.u32 2147483647, %v65_v51 }
  0x65   :  { %p1405_p4 = pnand %p1404_p3, %p1398_p0 }
  0x66   :  { %v708_v34 = vadd.f32 %v707_v31, %v705_v32  ;;  %v709_v35 = vadd.f32 %v707_v31, %v706_v33  ;;  %v1714_v3 = vmul.f32 2.0, %v66_v4 }
  0x68   :  { %v710_v36 = vsel %vm98_vm1, %v708_v34, 0.0  ;;  %v711_v38 = vsel %vm98_vm1, %v709_v35, 0.0  ;;  %v190_v16 = vmul.f32 0.0, %v1714_v3 }
  0x69   :  { %v712_v40 = vadd.f32 %v711_v38, %v710_v36 }
  0x6a   :  { %v191_v23 = vsub.f32 %v189_v15, %v190_v16  ;;  %v512_v15 = vsub.f32 %v1618_v13, %v1631_v25  ;;  %v513_v16 = vsub.f32 %v1618_v13, %v1636_v28  ;;  %v828_v25 = vsub.f32 %v1676_v22, %v1688_v39 }
  0x6b   :  { %v713_v41 = vmul.f32 0.5, %v712_v40  ;;  %v829_v28 = vsub.f32 %v1676_v22, %v1693_v0  ;;  %v1106_v0 = vld [vmem:[%s1944_s0 + $0xf] sm:$0x1] }
  0x6c   :  { %v193_v31 = vsub.f32 %v191_v23, %v1730_v24 }
  0x6d   :  { %v840_v44 = vmul.f32 0.5, %v713_v41  ;;  %v849_v45 = vmul.f32 %v713_v41, %v1560_v9  ;;  %v865_v8 = vmul.f32 0.1, %v713_v41 }
  0x6e   :  { %v194_v35 = vmul.f32 0.5, %v193_v31 }
  0x6f   :  { %v841_v48 = vadd.f32 %v840_v44, %v1676_v22  ;;  %v850_v49 = vsub.f32 %v847_v42, %v849_v45  ;;  %v851_v50 = vsub.f32 %v848_v43, %v849_v45  ;;  %v59_v45 = vld [vmem:[%s1951_s7] sm:$0x1]  ;;  %v1105_v22 = vld [vmem:[%s1944_s0 + $0x7] sm:$0x1] }
  0x70   :  { %v1273_v40 = vclamps-f32 %v194_v35, 5.0 }
  0x71   :  { %v1306_v52 = vclamps-f32 %v841_v48, 5.0  ;;  %v853_v56 = vsub.f32 %v850_v49, %v852_v46  ;;  %v854_v57 = vsub.f32 %v851_v50, %v852_v46  ;;  %v60_v46 = vand.u32 2147483647, %v59_v45  ;;  %v57_v48 = vld [vmem:[%s1950_s6] sm:$0x1] }
  0x72   :  { %v1759_v50 = vld [vmem:[%s1949_s5] sm:$0x1]  ;;  %v1761_v51 = vmul.f32 %v57_v48, %v57_v48 }
  0x73   :  { %v844_v58 = vmul.f32 0.9, %v1306_v52  ;;  %v855_v59 = vmul.f32 0.5, %v853_v56  ;;  %v856_v9 = vmul.f32 0.5, %v854_v57  ;;  %v1754_v49 = vmul.f32 2.0, %v60_v46 }
  0x74   :  { %v1766_v52 = vld [vmem:[%s1952_s8] sm:$0x1] }
  0x75   :  { %v1707_v60 = vadd.f32 %v845_v55, %v844_v58  ;;  %v857_v6 = vadd.f32 %v855_v59, %v713_v41  ;;  %v858_v63 = vadd.f32 %v856_v9, %v713_v41  ;;  %v1739_v41 = vmul.f32 0.9, %v1273_v40 }
  0x76   :  { %v179_v57 = vmul.f32 0.0, %v1754_v49  ;;  %v1775_v59 = vmul.f32 0.0, %v1761_v51  ;;  %v204_v9 = vsub.f32 0.0, %v1577_v26 }
  0x77   :  { %1369 = vmatmul.mubr.msk.f32.vlgmr.msra.gmra.mxu1 %vm104_vm2, %v1707_v60  ;;  %v1307_v5 = vclamps-f32 %v857_v6, 5.0  ;;  %v1308_v7 = vclamps-f32 %v858_v63, 5.0  ;;  %v1003_v34 = vmul.f32 0.1, %v1707_v60  ;;  %v334_v42 = vmul.f32 0.5, %v1739_v41 }
  0x78   :  { %1384 = vmatprep.mubr.msk.f32.mxu1 %vm1442_vm0, %v1441_v2  ;;  %v205_v6 = vsub.f32 0.0, %v1582_v27  ;;  %v354_v63 = vsub.f32 %v1589_v37, %v1602_v53  ;;  %v670_v27 = vsub.f32 %v1647_v47, %v1660_v61  ;;  %v671_v53 = vsub.f32 %v1647_v47, %v1665_v62  ;;  %v984_v61 = vld [vmem:[%s1944_s0 + $0x6] sm:$0x1]  ;;  %v985_v47 = vld [vmem:[%s1944_s0 + $0xe] sm:$0x1] }
  0x79   :  { %v863_v11 = vmul.f32 0.9, %v1307_v5  ;;  %v864_v12 = vmul.f32 0.9, %v1308_v7  ;;  %v1280_v43 = vclamps-f32 %v334_v42, 5.0  ;;  %v355_v5 = vsub.f32 %v1589_v37, %v1607_v54 }
  0x7a   :  { %v207_v10 = vmul.f32 %v205_v6, %v205_v6  ;;  %v987_v31 = vsub.f32 %v1707_v60, %v985_v47 }
  0x7b   :  { %v866_v17 = vadd.f32 %v865_v8, %v863_v11  ;;  %v867_v18 = vadd.f32 %v865_v8, %v864_v12  ;;  %v1742_v44 = vmul.f32 0.9, %v1280_v43  ;;  %v206_v8 = vmul.f32 %v204_v9, %v204_v9 }
  0x7c   :  { %v356_v11 = vmul.f32 %v354_v63, %v354_v63  ;;  %v357_v12 = vmul.f32 %v355_v5, %v355_v5  ;;  %v341_v63 = vmul.f32 %v1739_v41, %v1714_v3 }
  0x7d   :  { %v868_v19 = vsel %vm98_vm1, %v866_v17, 0.0  ;;  %v869_v20 = vsel %vm98_vm1, %v867_v18, 0.0  ;;  %351 = vst.msk [vmem:[#allocation2 + $0x1] sm:$0x1] %vm200_vm3, %v1742_v44  ;;  %v514_v17 = vmul.f32 %v512_v15, %v512_v15  ;;  %v515_v18 = vmul.f32 %v513_v16, %v513_v16 }
  0x7e   :  { %v870_v21 = vadd.f32 %v869_v20, %v868_v19  ;;  %v358_v37 = vadd.f32 %v356_v11, %v206_v8  ;;  %v359_v54 = vadd.f32 %v357_v12, %v207_v10  ;;  %v672_v20 = vmul.f32 %v670_v27, %v670_v27 }
  0x80   :  { %v871_v29 = vmul.f32 0.5, %v870_v21  ;;  %v673_v21 = vmul.f32 %v671_v53, %v671_v53  ;;  %v516_v23 = vadd.f32 %v514_v17, %v358_v37  ;;  %v517_v13 = vadd.f32 %v515_v18, %v359_v54 }
  0x82   :  { %v998_v30 = vmul.f32 0.5, %v871_v29  ;;  %v830_v29 = vmul.f32 %v828_v25, %v828_v25  ;;  %v674_v39 = vadd.f32 %v672_v20, %v516_v23 }
  0x84   :  { %v999_v32 = vadd.f32 %v998_v30, %v1707_v60  ;;  %v986_v30 = vsub.f32 %v1707_v60, %v984_v61  ;;  %v832_v42 = vadd.f32 %v830_v29, %v674_v39 }
  0x86   :  { %v1314_v33 = vclamps-f32 %v999_v32, 5.0  ;;  %v675_v32 = vadd.f32 %v673_v21, %v517_v13  ;;  %v988_v35 = vmul.f32 %v986_v30, %v986_v30 }
  0x88   :  { %v1002_v36 = vmul.f32 0.9, %v1314_v33  ;;  %v831_v33 = vmul.f32 %v829_v28, %v829_v28  ;;  %v990_v48 = vadd.f32 %v988_v35, %v832_v42  ;;  %v74_v35 = vld [vmem:[%s1956_s12 + $0x18] sm:$0xff] }
  0x89   :  { %1377 = vmatpush3.msra.mxu1 %v74_v35 }
  0x8a   :  { %v1735_v38 = vadd.f32 %v1003_v34, %v1002_v36  ;;  %v989_v36 = vmul.f32 %v987_v31, %v987_v31  ;;  %v833_v43 = vadd.f32 %v831_v33, %v675_v32  ;;  %1378 = vmatprep.subr.mxu1 %v1441_v2 }
  0x8c   :  { %1374 = vmatmul.mubr.msk.f32.vlgmr.msra.gmra.mxu0 %vm104_vm2, %v1735_v38  ;;  %v1107_v40 = vsub.f32 %v1735_v38, %v1105_v22  ;;  %v1108_v60 = vsub.f32 %v1735_v38, %v1106_v0  ;;  %v495_v22 = vmul.f32 0.1, %v1742_v44 }
  0x8e   :  { %v1109_v46 = vmul.f32 %v1107_v40, %v1107_v40 }
  0xc3   :  { %v174_v55 = vpop.f32.mrf.mxu0 }
  0xc4   :  { %v1769_v56 = vadd.f32 %v174_v55, %v1759_v50  ;;  %v991_v55 = vadd.f32 %v989_v36, %v833_v43 }
  0xc5   :  { %v1345_v4 = vpop.f32.mrf.mxu0 }
  0xc6   :  { %v178_v58 = vmul.f32 %v1769_v56, %v1766_v52  ;;  %v210_v12 = vsub.f32 0.0, %v1769_v56 }
  0xc8   :  { %v180_v7 = vsub.f32 %v178_v58, %v179_v57  ;;  %v1110_v57 = vmul.f32 %v1108_v60, %v1108_v60  ;;  %v1111_v58 = vadd.f32 %v1109_v46, %v990_v48  ;;  %v211_v17 = vmul.f32 %v210_v12, %v210_v12  ;;  %v71_v60 = vld [vmem:[%s1956_s12] sm:$0xff] }
  0xca   :  { %v182_v26 = vsub.f32 %v180_v7, %v1775_v59  ;;  %v1112_v9 = vadd.f32 %v1110_v57, %v991_v55  ;;  %v1210_v5 = vsel %vm98_vm1, %v1111_v58, 0.0 }
  0xcc   :  { %v183_v19 = vmul.f32 0.5, %v182_v26  ;;  %v1211_v7 = vsel %vm98_vm1, %v1112_v9, 0.0 }
  0xcd   :  { %v1212_v8 = vadd.f32 %v1211_v7, %v1210_v5 }
  0xce   :  { %v1272_v62 = vclamps-f32 %v183_v19, 5.0 }
  0xcf   :  { %v1213_v11 = vsel %vm98_vm1, %v1212_v8, 0.0  ;;  %v500_v8 = vmul.f32 %v1742_v44, %v1723_v14 }
  0xd0   :  { %v187_v34 = vmul.f32 0.9, %v1272_v62  ;;  %1214 = vadd.xlane.f32.xlu0 %v1213_v11 }
  0xd2   :  { %v317_v45 = vmul.f32 0.5, %v187_v34  ;;  %v324_v27 = vmul.f32 %v187_v34, %v1754_v49  ;;  %v332_v32 = vmul.f32 0.1, %v187_v34 }
  0xd4   :  { %v1278_v4 = vclamps-f32 %v317_v45, 5.0 }
  0xd6   :  { %v1812_v6 = vmul.f32 0.9, %v1278_v4 }
  0xd8   :  { %v340_v38 = vmul.f32 %v1812_v6, %v1712_v1  ;;  %v363_v37 = vsub.f32 %v1742_v44, %v1812_v6  ;;  %v476_v48 = vmul.f32 0.1, %v1812_v6 }
  0xda   :  { %v342_v10 = vsub.f32 %v340_v38, %v341_v63  ;;  %v364_v25 = vmul.f32 %v363_v37, %v363_v37  ;;  %v481_v38 = vmul.f32 %v1812_v6, %v1761_v51 }
  0xdc   :  { %v343_v15 = vsub.f32 %v342_v10, %v1730_v24  ;;  %v349_v24 = vmul.f32 0.1, %v1739_v41 }
  0xde   :  { %v344_v53 = vmul.f32 0.5, %v343_v15 }
  0xdf   :  { %v313_v16 = vpop.f32.mrf.mxu1 }
  0xe0   :  { %v314_v26 = vadd.f32 %v313_v16, %v1759_v50  ;;  %v345_v56 = vadd.f32 %v344_v53, %v1739_v41 }
  0xe1   :  { %v1350_v54 = vpop.f32.mrf.mxu1 }
  0xe2   :  { %v323_v18 = vmul.f32 %v314_v26, %v1766_v52  ;;  %v360_v19 = vsub.f32 %v1812_v6, %v314_v26  ;;  %v1281_v23 = vclamps-f32 %v345_v56, 5.0 }
  0xe4   :  { %v325_v20 = vsub.f32 %v323_v18, %v324_v27  ;;  %v361_v21 = vmul.f32 %v360_v19, %v360_v19  ;;  %v348_v61 = vmul.f32 0.9, %v1281_v23 }
  0xe6   :  { %v326_v13 = vsub.f32 %v325_v20, %v1775_v59  ;;  %v362_v28 = vadd.f32 %v361_v21, %v211_v17  ;;  %v350_v29 = vadd.f32 %v349_v24, %v348_v61  ;;  %v73_v59 = vld [vmem:[%s1956_s12 + $0x10] sm:$0xff] }
  0xe7   :  { %1379 = vmatpush3.msra.mxu1 %v73_v59 }
  0xe8   :  { %v327_v47 = vmul.f32 0.5, %v326_v13  ;;  %v365_v62 = vadd.f32 %v364_v25, %v362_v28  ;;  %v490_v31 = vmul.f32 0.5, %v350_v29  ;;  %1380 = vmatprep.subr.mxu1 %v1441_v2  ;;  %v498_v5 = vmul.f32 %v350_v29, %v1714_v3 }
  0xe9   :  { %v507_v20 = vmul.f32 0.1, %v350_v29 }
  0xea   :  { %v328_v30 = vadd.f32 %v327_v47, %v187_v34  ;;  %v491_v33 = vadd.f32 %v490_v31, %v1742_v44  ;;  %v72_v34 = vld [vmem:[%s1956_s12 + $0x8] sm:$0xff] }
  0xeb   :  { %1381 = vmatpush3.msra.mxu1 %v72_v34 }
  0xec   :  { %v1279_v39 = vclamps-f32 %v328_v30, 5.0  ;;  %v1288_v0 = vclamps-f32 %v491_v33, 5.0  ;;  %1382 = vmatprep.subr.mxu1 %v1441_v2 }
  0xed   :  { %1383 = vmatpush3.msra.mxu1 %v71_v60 }
  0xee   :  { %v331_v41 = vmul.f32 0.9, %v1279_v39  ;;  %v494_v40 = vmul.f32 0.9, %v1288_v0 }
  0xf0   :  { %v333_v36 = vadd.f32 %v332_v32, %v331_v41  ;;  %v1844_v43 = vadd.f32 %v495_v22, %v494_v40 }
  0xf2   :  { %v471_v42 = vmul.f32 0.5, %v333_v36  ;;  %509 = vst.msk [vmem:[#allocation2 + $0x2] sm:$0x1] %vm200_vm3, %v1844_v43  ;;  %v479_v58 = vmul.f32 %v333_v36, %v1754_v49  ;;  %v488_v21 = vmul.f32 0.1, %v333_v36 }
  0xf3   :  { %v653_v41 = vmul.f32 0.1, %v1844_v43 }
  0xf4   :  { %v472_v45 = vadd.f32 %v471_v42, %v1812_v6 }
  0xf6   :  { %v1286_v46 = vclamps-f32 %v472_v45, 5.0 }
  0xf8   :  { %v467_v55 = vpop.f32.mrf.mxu0  ;;  %v475_v57 = vmul.f32 0.9, %v1286_v46 }
  0xf9   :  { %v468_v4 = vadd.f32 %v467_v55, %v1759_v50 }
  0xfa   :  { %v477_v9 = vadd.f32 %v476_v48, %v475_v57  ;;  %v1355_v63 = vpop.f32.mrf.mxu0  ;;  %v658_v48 = vmul.f32 %v1844_v43, %v1723_v14 }
  0xfb   :  { %v478_v7 = vmul.f32 %v468_v4, %v1766_v52 }
  0xfc   :  { %v497_v2 = vmul.f32 %v477_v9, %v1712_v1  ;;  %v518_v10 = vsub.f32 %v477_v9, %v468_v4  ;;  %v521_v11 = vsub.f32 %v1844_v43, %v477_v9  ;;  %v634_v35 = vmul.f32 0.1, %v477_v9 }
  0xfd   :  { %v480_v12 = vsub.f32 %v478_v7, %v479_v58 }
  0xfe   :  { %v519_v15 = vmul.f32 %v518_v10, %v518_v10  ;;  %v522_v16 = vmul.f32 %v521_v11, %v521_v11  ;;  %v499_v26 = vsub.f32 %v497_v2, %v498_v5 }
  0xff   :  { %v482_v27 = vsub.f32 %v480_v12, %v481_v38 }
 0x100   :  { %v520_v53 = vadd.f32 %v519_v15, %v365_v62  ;;  %v501_v37 = vsub.f32 %v499_v26, %v500_v8 }
 0x101   :  { %v483_v54 = vmul.f32 0.5, %v482_v27 }
 0x102   :  { %v1865_v17 = vadd.f32 %v522_v16, %v520_v53  ;;  %v502_v18 = vmul.f32 0.5, %v501_v37 }
 0x103   :  { %v484_v6 = vadd.f32 %v483_v54, %v333_v36  ;;  %v639_v36 = vmul.f32 %v477_v9, %v1761_v51 }
 0x104   :  { %v503_v19 = vadd.f32 %v502_v18, %v350_v29 }
 0x105   :  { %v1287_v56 = vclamps-f32 %v484_v6, 5.0 }
 0x106   :  { %v1289_v24 = vclamps-f32 %v503_v19, 5.0 }
 0x107   :  { %v487_v44 = vmul.f32 0.9, %v1287_v56 }
 0x108   :  { %v506_v25 = vmul.f32 0.9, %v1289_v24 }
 0x109   :  { %v489_v23 = vadd.f32 %v488_v21, %v487_v44 }
 0x10a   :  { %v508_v13 = vadd.f32 %v507_v20, %v506_v25 }
 0x10b   :  { %v629_v28 = vmul.f32 0.5, %v489_v23  ;;  %v637_v29 = vmul.f32 %v489_v23, %v1754_v49  ;;  %v646_v7 = vmul.f32 0.1, %v489_v23 }
 0x10c   :  { %v648_v61 = vmul.f32 0.5, %v508_v13  ;;  %v656_v42 = vmul.f32 %v508_v13, %v1714_v3  ;;  %v665_v12 = vmul.f32 0.1, %v508_v13 }
 0x10d   :  { %v630_v47 = vadd.f32 %v629_v28, %v477_v9  ;;  %v625_v30 = vpop.f32.mrf.mxu1 }
 0x10e   :  { %v1868_v62 = vadd.f32 %v625_v30, %v1759_v50  ;;  %v649_v31 = vadd.f32 %v648_v61, %v1844_v43 }
 0x10f   :  { %v1294_v39 = vclamps-f32 %v630_v47, 5.0  ;;  %v1360_v32 = vpop.f32.mrf.mxu1 }
 0x110   :  { %v636_v33 = vmul.f32 %v1868_v62, %v1766_v52  ;;  %v1296_v22 = vclamps-f32 %v649_v31, 5.0 }
 0x111   :  { %v633_v0 = vmul.f32 0.9, %v1294_v39 }
 0x112   :  { %v638_v59 = vsub.f32 %v636_v33, %v637_v29  ;;  %v652_v40 = vmul.f32 0.9, %v1296_v22 }
 0x113   :  { %v1876_v34 = vadd.f32 %v634_v35, %v633_v0 }
 0x114   :  { %v640_v60 = vsub.f32 %v638_v59, %v639_v36  ;;  %v1879_v45 = vadd.f32 %v653_v41, %v652_v40 }
 0x115   :  { %v655_v46 = vmul.f32 %v1876_v34, %v1712_v1  ;;  %v792_v19 = vmul.f32 0.1, %v1876_v34  ;;  %v797_v24 = vmul.f32 %v1876_v34, %v1761_v51 }
 0x116   :  { %v641_v55 = vmul.f32 0.5, %v640_v60  ;;  %667 = vst.msk [vmem:[#allocation2 + $0x3] sm:$0x1] %vm200_vm3, %v1879_v45  ;;  %v811_v47 = vmul.f32 0.1, %v1879_v45  ;;  %v816_v30 = vmul.f32 %v1879_v45, %v1723_v14 }
 0x117   :  { %v657_v57 = vsub.f32 %v655_v46, %v656_v42 }
 0x118   :  { %v642_v4 = vadd.f32 %v641_v55, %v489_v23 }
 0x119   :  { %v659_v58 = vsub.f32 %v657_v57, %v658_v48 }
 0x11a   :  { %v1295_v9 = vclamps-f32 %v642_v4, 5.0 }
 0x11b   :  { %v660_v63 = vmul.f32 0.5, %v659_v58 }
 0x11c   :  { %v645_v5 = vmul.f32 0.9, %v1295_v9 }
 0x11d   :  { %v661_v38 = vadd.f32 %v660_v63, %v508_v13 }
 0x11e   :  { %v647_v2 = vadd.f32 %v646_v7, %v645_v5 }
 0x11f   :  { %v1297_v8 = vclamps-f32 %v661_v38, 5.0 }
 0x120   :  { %v787_v10 = vmul.f32 0.5, %v647_v2  ;;  %v795_v54 = vmul.f32 %v647_v2, %v1754_v49  ;;  %v804_v0 = vmul.f32 0.1, %v647_v2 }
 0x121   :  { %v664_v11 = vmul.f32 0.9, %v1297_v8 }
 0x122   :  { %v788_v15 = vadd.f32 %v787_v10, %v1876_v34  ;;  %v783_v43 = vpop.f32.mrf.mxu0 }
 0x123   :  { %v1889_v16 = vadd.f32 %v783_v43, %v1759_v50  ;;  %v666_v26 = vadd.f32 %v665_v12, %v664_v11 }
 0x124   :  { %v1302_v27 = vclamps-f32 %v788_v15, 5.0  ;;  %v1365_v53 = vpop.f32.mrf.mxu0 }
 0x125   :  { %v794_v37 = vmul.f32 %v1889_v16, %v1766_v52  ;;  %v806_v18 = vmul.f32 0.5, %v666_v26  ;;  %v814_v13 = vmul.f32 %v666_v26, %v1714_v3  ;;  %v823_v60 = vmul.f32 0.1, %v666_v26 }
 0x126   :  { %v791_v6 = vmul.f32 0.9, %v1302_v27 }
 0x127   :  { %v796_v56 = vsub.f32 %v794_v37, %v795_v54  ;;  %v807_v20 = vadd.f32 %v806_v18, %v1879_v45 }
 0x128   :  { %v1898_v44 = vadd.f32 %v792_v19, %v791_v6 }
 0x129   :  { %v798_v21 = vsub.f32 %v796_v56, %v797_v24  ;;  %v1304_v25 = vclamps-f32 %v807_v20, 5.0 }
 0x12a   :  { %v813_v23 = vmul.f32 %v1898_v44, %v1712_v1  ;;  %v950_v38 = vmul.f32 0.1, %v1898_v44  ;;  %v955_v8 = vmul.f32 %v1898_v44, %v1761_v51  ;;  %v676_v51 = vsub.f32 %v1876_v34, %v1868_v62 }
 0x12b   :  { %v799_v28 = vmul.f32 0.5, %v798_v21  ;;  %v810_v61 = vmul.f32 0.9, %v1304_v25 }
 0x12c   :  { %v815_v31 = vsub.f32 %v813_v23, %v814_v13  ;;  %v677_v23 = vmul.f32 %v676_v51, %v676_v51  ;;  %v679_v13 = vsub.f32 %v1879_v45, %v1876_v34 }
 0x12d   :  { %v800_v39 = vadd.f32 %v799_v28, %v647_v2  ;;  %v812_v32 = vadd.f32 %v811_v47, %v810_v61  ;;  %v834_v47 = vsub.f32 %v1898_v44, %v1889_v16 }
 0x12e   :  { %v817_v33 = vsub.f32 %v815_v31, %v816_v30  ;;  %v678_v62 = vadd.f32 %v677_v23, %v1865_v17 }
 0x12f   :  { %v1303_v29 = vclamps-f32 %v800_v39, 5.0  ;;  %825 = vst.msk [vmem:[#allocation2 + $0x4] sm:$0x1] %vm200_vm3, %v812_v32  ;;  %v969_v53 = vmul.f32 0.1, %v812_v32  ;;  %v974_v37 = vmul.f32 %v812_v32, %v1723_v14 }
 0x130   :  { %v818_v22 = vmul.f32 0.5, %v817_v33 }
 0x131   :  { %v803_v41 = vmul.f32 0.9, %v1303_v29  ;;  %v680_v29 = vmul.f32 %v679_v13, %v679_v13 }
 0x132   :  { %v819_v35 = vadd.f32 %v818_v22, %v666_v26  ;;  %v837_v22 = vsub.f32 %v812_v32, %v1898_v44 }
 0x133   :  { %v805_v59 = vadd.f32 %v804_v0, %v803_v41  ;;  %v681_v16 = vadd.f32 %v680_v29, %v678_v62 }
 0x134   :  { %v1305_v36 = vclamps-f32 %v819_v35, 5.0 }
 0x135   :  { %v945_v40 = vmul.f32 0.5, %v805_v59  ;;  %v953_v63 = vmul.f32 %v805_v59, %v1754_v49  ;;  %v962_v20 = vmul.f32 0.1, %v805_v59 }
 0x136   :  { %v822_v42 = vmul.f32 0.9, %v1305_v36 }
 0x137   :  { %v941_v46 = vpop.f32.mrf.mxu1  ;;  %v946_v48 = vadd.f32 %v945_v40, %v1898_v44 }
 0x138   :  { %v824_v55 = vadd.f32 %v823_v60, %v822_v42  ;;  %v942_v57 = vadd.f32 %v941_v46, %v1759_v50  ;;  %v838_v60 = vmul.f32 %v837_v22, %v837_v22 }
 0x139   :  { %v1310_v4 = vclamps-f32 %v946_v48, 5.0  ;;  %v1370_v58 = vpop.f32.mrf.mxu1 }
 0x13a   :  { %v952_v9 = vmul.f32 %v942_v57, %v1766_v52  ;;  %v964_v5 = vmul.f32 0.5, %v824_v55  ;;  %v972_v26 = vmul.f32 %v824_v55, %v1714_v3  ;;  %v981_v31 = vmul.f32 0.1, %v824_v55 }
 0x13b   :  { %v949_v7 = vmul.f32 0.9, %v1310_v4 }
 0x13c   :  { %v954_v2 = vsub.f32 %v952_v9, %v953_v63  ;;  %v965_v10 = vadd.f32 %v964_v5, %v812_v32 }
 0x13d   :  { %v951_v11 = vadd.f32 %v950_v38, %v949_v7 }
 0x13e   :  { %v956_v12 = vsub.f32 %v954_v2, %v955_v8  ;;  %v1312_v15 = vclamps-f32 %v965_v10, 5.0 }
 0x13f   :  { %v971_v43 = vmul.f32 %v951_v11, %v1712_v1  ;;  %v992_v36 = vsub.f32 %v951_v11, %v942_v57  ;;  %v1083_v42 = vmul.f32 0.1, %v951_v11 }
 0x140   :  { %v957_v27 = vmul.f32 0.5, %v956_v12  ;;  %v968_v52 = vmul.f32 0.9, %v1312_v15 }
 0x141   :  { %v973_v49 = vsub.f32 %v971_v43, %v972_v26  ;;  %v993_v17 = vmul.f32 %v992_v36, %v992_v36 }
 0x142   :  { %v958_v54 = vadd.f32 %v957_v27, %v805_v59  ;;  %v970_v18 = vadd.f32 %v969_v53, %v968_v52  ;;  %v835_v59 = vmul.f32 %v834_v47, %v834_v47 }
 0x143   :  { %v975_v6 = vsub.f32 %v973_v49, %v974_v37 }
 0x144   :  { %v1311_v19 = vclamps-f32 %v958_v54, 5.0  ;;  %983 = vst.msk [vmem:[#allocation2 + $0x5] sm:$0x1] %vm200_vm3, %v970_v18  ;;  %v995_v46 = vsub.f32 %v970_v18, %v951_v11  ;;  %v836_v4 = vadd.f32 %v835_v59, %v681_v16  ;;  %v1090_v7 = vmul.f32 0.1, %v970_v18 }
 0x145   :  { %v976_v56 = vmul.f32 0.5, %v975_v6  ;;  %v1095_v38 = vmul.f32 %v970_v18, %v1723_v14 }
 0x146   :  { %v961_v24 = vmul.f32 0.9, %v1311_v19  ;;  %v839_v63 = vadd.f32 %v838_v60, %v836_v4  ;;  %v996_v57 = vmul.f32 %v995_v46, %v995_v46 }
 0x147   :  { %v977_v21 = vadd.f32 %v976_v56, %v824_v55 }
 0x148   :  { %v963_v25 = vadd.f32 %v962_v20, %v961_v24  ;;  %v994_v2 = vadd.f32 %v993_v17, %v839_v63 }
 0x149   :  { %v1313_v28 = vclamps-f32 %v977_v21, 5.0 }
 0x14a   :  { %v1078_v61 = vmul.f32 0.5, %v963_v25  ;;  %v997_v12 = vadd.f32 %v996_v57, %v994_v2 }
 0x14b   :  { %v980_v30 = vmul.f32 0.9, %v1313_v28 }
 0x14c   :  { %v1074_v39 = vpop.f32.mrf.mxu0  ;;  %v1079_v33 = vadd.f32 %v1078_v61, %v951_v11 }
 0x14d   :  { %v982_v41 = vadd.f32 %v981_v31, %v980_v30  ;;  %v1075_v45 = vadd.f32 %v1074_v39, %v1759_v50 }
 0x14e   :  { %v1316_v0 = vclamps-f32 %v1079_v33, 5.0  ;;  %v1375_v35 = vpop.f32.mrf.mxu0 }
 0x14f   :  { %v1085_v34 = vmul.f32 0.5, %v982_v41  ;;  %v1093_v32 = vmul.f32 %v982_v41, %v1714_v3  ;;  %v1102_v37 = vmul.f32 0.1, %v982_v41 }
 0x150   :  { %v1082_v40 = vmul.f32 0.9, %v1316_v0 }
 0x151   :  { %v1086_v48 = vadd.f32 %v1085_v34, %v970_v18 }
 0x152   :  { %v1084_v55 = vadd.f32 %v1083_v42, %v1082_v40 }
 0x153   :  { %v1317_v58 = vclamps-f32 %v1086_v48, 5.0 }
 0x154   :  { %v1092_v44 = vmul.f32 %v1084_v55, %v1712_v1  ;;  %v1113_v9 = vsub.f32 %v1084_v55, %v1075_v45 }
 0x155   :  { %v1089_v5 = vmul.f32 0.9, %v1317_v58 }
 0x156   :  { %v1094_v50 = vsub.f32 %v1092_v44, %v1093_v32  ;;  %v1114_v8 = vmul.f32 %v1113_v9, %v1113_v9 }
 0x157   :  { %v1091_v10 = vadd.f32 %v1090_v7, %v1089_v5 }
 0x158   :  { %v1096_v11 = vsub.f32 %v1094_v50, %v1095_v38  ;;  %v1115_v1 = vadd.f32 %v1114_v8, %v997_v12 }
 0x159   :  { %1104 = vst.msk [vmem:[#allocation2 + $0x6] sm:$0x1] %vm200_vm3, %v1091_v10  ;;  %v1116_v15 = vsub.f32 %v1091_v10, %v1084_v55  ;;  %v1215_v6 = vpop.xlane.xlu0 %1214  ;;  %v1124_v56 = vmul.f32 0.1, %v1091_v10 }
 0x15a   :  { %v1097_v43 = vmul.f32 0.5, %v1096_v11  ;;  %v1216_v51 = vrot.slane %v1215_v6, 4 }
 0x15b   :  { %v1117_v26 = vmul.f32 %v1116_v15, %v1116_v15 }
 0x15c   :  { %v1098_v3 = vadd.f32 %v1097_v43, %v982_v41  ;;  %v1217_v20 = vadd.f32 %v1216_v51, %v1215_v6 }
 0x15d   :  { %v1118_v27 = vadd.f32 %v1117_v26, %v1115_v1 }
 0x15e   :  { %v1318_v52 = vclamps-f32 %v1098_v3, 5.0  ;;  %v1218_v25 = vrot.slane %v1217_v20, 2 }
 0x15f   :  { %v1224_v53 = vsel %vm200_vm3, %v1118_v27, 0.0 }
 0x160   :  { %v1101_v49 = vmul.f32 0.9, %v1318_v52  ;;  %1225 = vadd.xlane.f32.xlu0 %v1224_v53  ;;  %v1219_v23 = vadd.f32 %v1218_v25, %v1217_v20 }
 0x162   :  { %v1103_v14 = vadd.f32 %v1102_v37, %v1101_v49  ;;  %v1220_v13 = vrot.slane %v1219_v23, 1 }
 0x164   :  { %v1119_v54 = vmul.f32 0.5, %v1103_v14  ;;  %v1221_v28 = vadd.f32 %v1220_v13, %v1219_v23 }
 0x166   :  { %v1120_v18 = vadd.f32 %v1119_v54, %v1091_v10  ;;  %1387 = vpush %v1221_v28 }
 0x168   :  { %v1319_v19 = vclamps-f32 %v1120_v18, 5.0 }
 0x16a   :  { %v1123_v24 = vmul.f32 0.9, %v1319_v19 }
 0x16c   :  { %v1125_v21 = vadd.f32 %v1124_v56, %v1123_v24 }
 0x16e   :  { %1126 = vst.msk [vmem:[#allocation2 + $0x7] sm:$0x1] %vm200_vm3, %v1125_v21 }
 0x175   :  { %v1127_v61 = vld [vmem:[#allocation2] sm:$0xff] }
 0x176   :  { %1385 = vmatmul.mubr.msk.f32.vlgmr.msra.gmra.mxu1 %vm1134_vm4, %v1127_v61 }
 0x197   :  { %s1388_s12 = spop %1387 }
 0x198   :  { %v1223_v22 = vstv %s1388_s12 }
 0x199   :  { %v1235_v41 = vmul.f32 0.0625, %v1223_v22 }
 0x1e9   :  { %v1226_v47 = vpop.xlane.xlu0 %1225 }
 0x1ea   :  { %v1227_v30 = vrot.slane %v1226_v47, 4 }
 0x1ec   :  { %v1228_v31 = vadd.f32 %v1227_v30, %v1226_v47 }
 0x1ee   :  { %v1229_v39 = vrot.slane %v1228_v31, 2 }
 0x1f0   :  { %v1230_v33 = vadd.f32 %v1229_v39, %v1228_v31 }
 0x1f2   :  { %v1231_v62 = vrot.slane %v1230_v33, 1 }
 0x1f4   :  { %v1232_v29 = vadd.f32 %v1231_v62, %v1230_v33 }
 0x1f6   :  { %1389 = vpush %v1232_v29 }
 0x227   :  { %s1390_s30 = spop %1389 }
 0x228   :  { %v1234_v0 = vstv %s1390_s30 }
 0x229   :  { %v1236_v35 = vmul.f32 0.03125, %v1234_v0 }
 0x22b   :  { %v1237_v59 = vadd.f32 %v1236_v35, %v1235_v41 }
 0x22d   :  { %1239 = vst.msk [vmem:[#allocation5] sm:$0x1] %vm1238_vm5, %v1237_v59 }
 0x22e   :  { %1408 = shalt.err (!%p1405_p4)
}
 0x22f   :  { %1261 = dma.vmem_to_hbm [thread:$0]  %s1259_s16, 16, %s1959_s15, [#allocation6]   ;;  %v1320_v36 = vld [vmem:[%s1957_s13] ss:$0 sm:$0xff] }
 0x230   :  { %s1444_s19 = smov [#allocation3]  }
 0x231   :  { %s1245_s20 = sshll.u32 %s1444_s19, 4  ;;  %s1246_s20 = int_to_ptr.vmem [resolvable:$true] %s1245_s20 }
 0x232   :  { %s1417_s5 = scalar_lea.vmem %s1246_s20, 256  ;;  %p1422_p6 = scmp.lt.s32.totalorder %s1246_s20, %s1246_s20 }
 0x233   :  { %p1418_p5 = scmp.ne.s32.totalorder %s1246_s20, %s1417_s5  ;;  %p1423_p7 = scmp.lt.s32.totalorder %s1417_s5, %s1417_s5 }
 0x235   :  { %p1424_p8 = por %p1423_p7, %p1422_p6 }
 0x236   :  { %v1204_v34 = vpop.f32.mrf.mxu1 }
 0x237   :  { %v1205_v45 = vadd.f32 %v1320_v36, %v1204_v34  ;;  %p1425_p9 = pnand %p1424_p8, %p1418_p5 }
 0x238   :  { %v1386_v40 = vpop.f32.mrf.mxu1 }
 0x239   :  { %1208 = vst.msk [vmem:[#allocation3] sm:$0xff] %vm104_vm2, %v1205_v45  ;;  %1209 = vst.msk [vmem:[#allocation3 + $0x8] sm:$0xff] %vm104_vm2, %v1205_v45 }
 0x23a   :  { %1428 = shalt.err (!%p1425_p9)
}
 0x23b   :  { %s1445_s15 = smov 128   ;;  %s1446_s6 = smov 8  }
 0x23c   :  { %1251 = dma.vmem_to_hbm [thread:$0]  %s1246_s20, 256, %s1958_s14, [#allocation4], %s1445_s15, %s1445_s15, %s1446_s6  }
 0x23d   :  { %1437 = dma.done.wait [#allocation4], 256  }
 0x23e   :  { %1438 = vsyncadd [#allocation4], 4294967040 }
 0x23f   :  { %1439 = dma.done.wait [#allocation6], 16  }
 0x240   :  { %1440 = vsyncadd [#allocation6], 4294967280 }
 0x241   :  { %1268 = vsyncpa [#allocation4], 1 }
 0x242   :  { %1269 = vsyncpa [#allocation6], 1 }

</bundles_post_ra>
